<compile_context>
chip_gen: v7x
topology: tpu7x:2x2x1
jax: 0.10.0
libtpu: 0.0.40
codegen_flags: <defaults>
</compile_context>

<pallas_src>
import jax
import jax.numpy as jnp
from jax.experimental import pallas as pl
from jax.experimental.pallas import tpu as pltpu


# ---------------------------------------------------------------------------
# Fused kernel: conv(im2col matmul)+ReLU -> GAP -> FC(512) -> embed(E) -> l2*10
# One grid step processes B_TILE images end-to-end, entirely in VMEM.
# ---------------------------------------------------------------------------
def _make_fused_kernel(B_TILE, HW, K_PAD, COUT_PAD):
    def kernel(x_ref, wc_ref, bc_ref, wf_ref, bf_ref, we_ref, be_ref, o_ref):
        # x_ref : (B_TILE, HW, K_PAD) bf16  im2col patches, lane-dense K=128
        # wc_ref: (K_PAD, COUT_PAD) bf16    merged 3x3 conv weights
        # bc_ref: (1, COUT_PAD) f32
        # wf_ref: (COUT_PAD, FEAT) bf16     GAP -> 512 FC (1/HW pre-folded)
        # bf_ref: (1, FEAT) f32
        # we_ref: (FEAT, E) bf16            embedding Linear(512, E)
        # be_ref: (1, E) f32
        # o_ref : (B_TILE, E) f32

        # ---- 3x3 "same" conv as ONE matmul, f32 accumulation ----
        x2d = x_ref[...].reshape(B_TILE * HW, K_PAD)          # trivial reshape
        acc = jnp.dot(x2d, wc_ref[...],
                      preferred_element_type=jnp.float32)     # (B*HW, 128)
        conv = jnp.maximum(acc + bc_ref[...], 0.0)

        # ---- global average pool (plain sum; 1/HW folded into wf) ----
        pooled = jnp.sum(conv.reshape(B_TILE, HW, COUT_PAD), axis=1)  # (B, 128)

        # ---- backbone FC -> 512 ----
        feat = jnp.dot(pooled.astype(jnp.bfloat16), wf_ref[...],
                       preferred_element_type=jnp.float32) + bf_ref[...]

        # ---- embedding Linear + l2_norm + alpha (exact module tail) ----
        y = jnp.dot(feat.astype(jnp.bfloat16), we_ref[...],
                    preferred_element_type=jnp.float32) + be_ref[...]
        normp = jnp.sum(y * y, axis=1, keepdims=True) + 1e-10  # eps on |y|^2
        o_ref[...] = (y * jax.lax.rsqrt(normp) * 10.0).astype(o_ref.dtype)

    return kernel


# ---------------------------------------------------------------------------
# Wrapper: layout prep (im2col, lane-dense padding, bf16) + fused pallas_call
# ---------------------------------------------------------------------------
def facenet_forward(x_nchw, params, *, b_tile=8):
    conv_w, conv_b, fc_w, fc_b, emb_w, emb_b = params
    B, C, H, W = x_nchw.shape
    HW = H * W
    KH, KW, _, COUT = conv_w.shape
    FEAT = fc_w.shape[1]
    E = emb_w.shape[1]

    K = KH * KW * C
    K_PAD = 128        # merged contraction dim, lane-dense (fills v5e MXU)
    COUT_PAD = 128     # lane-dense conv output channels
    assert K <= K_PAD and COUT <= COUT_PAD

    B_pad = ((B + b_tile - 1) // b_tile) * b_tile

    # ---- input: NCHW -> NHWC, pad batch + spatial border, im2col, bf16 ----
    x_nhwc = jnp.transpose(x_nchw, (0, 2, 3, 1))
    x_sp = jnp.pad(x_nhwc, ((0, B_pad - B), (1, 1), (1, 1), (0, 0)))
    patches = [x_sp[:, di:di + H, dj:dj + W, :]
               for di in range(KH) for dj in range(KW)]          # (di,dj,c) order
    x_im = jnp.concatenate(patches, axis=-1).reshape(B_pad, HW, K)
    x_im = jnp.pad(x_im, ((0, 0), (0, 0), (0, K_PAD - K))).astype(jnp.bfloat16)

    # ---- parameters in lane-dense, zero-padded, bf16 layouts ----
    wc = jnp.zeros((K_PAD, COUT_PAD), jnp.float32)
    wc = wc.at[:K, :COUT].set(conv_w.reshape(K, COUT)).astype(jnp.bfloat16)
    bc = jnp.zeros((1, COUT_PAD), jnp.float32).at[0, :COUT].set(conv_b)
    wf = jnp.zeros((COUT_PAD, FEAT), jnp.float32)
    wf = wf.at[:COUT, :].set(fc_w * (1.0 / HW)).astype(jnp.bfloat16)  # GAP scale
    bf = fc_b.reshape(1, FEAT).astype(jnp.float32)
    we = emb_w.astype(jnp.bfloat16)
    be = emb_b.reshape(1, E).astype(jnp.float32)

    kernel = _make_fused_kernel(B_TILE=b_tile, HW=HW, K_PAD=K_PAD,
                                COUT_PAD=COUT_PAD)

    out = pl.pallas_call(
        kernel,
        out_shape=jax.ShapeDtypeStruct((B_pad, E), jnp.float32),
        grid=(B_pad // b_tile,),
        in_specs=[
            pl.BlockSpec((b_tile, HW, K_PAD), lambda b: (b, 0, 0)),
            pl.BlockSpec((K_PAD, COUT_PAD), lambda b: (0, 0)),
            pl.BlockSpec((1, COUT_PAD), lambda b: (0, 0)),
            pl.BlockSpec((COUT_PAD, FEAT), lambda b: (0, 0)),
            pl.BlockSpec((1, FEAT), lambda b: (0, 0)),
            pl.BlockSpec((FEAT, E), lambda b: (0, 0)),
            pl.BlockSpec((1, E), lambda b: (0, 0)),
        ],
        out_specs=pl.BlockSpec((b_tile, E), lambda b: (b, 0)),
        compiler_params=pltpu.CompilerParams(
            dimension_semantics=("parallel",)),
    )(x_im, wc, bc, wf, bf, we, be)
    return out[:B]


# ---------------------------------------------------------------------------
# Pure-JAX f32 reference (same stand-in backbone) for correctness checking
# ---------------------------------------------------------------------------
def facenet_reference(x_nchw, params):
    conv_w, conv_b, fc_w, fc_b, emb_w, emb_b = params
    x = jnp.transpose(x_nchw, (0, 2, 3, 1))
    conv = jax.lax.conv_general_dilated(
        x, conv_w, window_strides=(1, 1), padding="SAME",
        dimension_numbers=("NHWC", "HWIO", "NHWC"))
    conv = jnp.maximum(conv + conv_b, 0.0)
    pooled = jnp.mean(conv, axis=(1, 2))
    feat = pooled @ fc_w + fc_b
    y = feat @ emb_w + emb_b
    normp = jnp.sum(y * y, axis=1, keepdims=True) + 1e-10
    return y / jnp.sqrt(normp) * 10.0


# ---------------------------------------------------------------------------
# Deterministic synthetic parameters + smoke test
# ---------------------------------------------------------------------------
def _init_params(key, cin=3, cout=8, feat_dim=512, embedding_size=256):
    ks = jax.random.split(key, 6)
    conv_w = jax.random.normal(ks[0], (3, 3, cin, cout), jnp.float32) * 0.1
    conv_b = jax.random.normal(ks[1], (cout,), jnp.float32) * 0.01
    fc_w = jax.random.normal(ks[2], (cout, feat_dim), jnp.float32) * 0.1
    fc_b = jax.random.normal(ks[3], (feat_dim,), jnp.float32) * 0.01
    emb_w = jax.random.normal(ks[4], (feat_dim, embedding_size), jnp.float32) * 0.05
    emb_b = jax.random.normal(ks[5], (embedding_size,), jnp.float32) * 0.01
    return conv_w, conv_b, fc_w, fc_b, emb_w, emb_b


if __name__ == "__main__":
    key = jax.random.PRNGKey(0)
    kx, kp = jax.random.split(key)

    # batch 16 -> 2 grid steps of 8 images (keeps both v7x TensorCores busy)
    B, C, H, W = 16, 3, 16, 16
    EMBED = 256

    x = jax.random.normal(kx, (B, C, H, W), jnp.float32)
    params = _init_params(kp, cin=C, cout=8, feat_dim=512,
                          embedding_size=EMBED)

    features = jax.block_until_ready(jax.jit(facenet_forward)(x, params))
    reference = jax.block_until_ready(facenet_reference(x, params))

    assert features.shape == (B, EMBED)
    assert features.dtype == jnp.float32
    # each row has L2 norm ~= alpha (=10) by construction of l2_norm * 10
    norms = jnp.sqrt(jnp.sum(features * features, axis=1))
    assert bool(jnp.all(jnp.abs(norms - 10.0) < 1e-2)), norms
    # match the pure-f32 reference (bf16 matmul operands -> loose tolerance)
    assert bool(jnp.allclose(features, reference, atol=5e-2, rtol=5e-2)), (
        float(jnp.max(jnp.abs(features - reference))))
    print("KERNEL_OK")
</pallas_src>

<mosaic_0001>
module attributes {stable_mosaic.version = 11 : i64} {
  func.func @kernel(%arg0: i32, %arg1: memref<8x256x128xbf16, #tpu.memory_space<vmem>>, %arg2: memref<128x128xbf16, #tpu.memory_space<vmem>>, %arg3: memref<1x128xf32, #tpu.memory_space<vmem>>, %arg4: memref<128x512xbf16, #tpu.memory_space<vmem>>, %arg5: memref<1x512xf32, #tpu.memory_space<vmem>>, %arg6: memref<512x256xbf16, #tpu.memory_space<vmem>>, %arg7: memref<1x256xf32, #tpu.memory_space<vmem>>, %arg8: memref<8x256xf32, #tpu.memory_space<vmem>>) attributes {dimension_semantics = [#tpu.dimension_semantics<parallel>], iteration_bounds = array<i64: 2>, scalar_prefetch = 0 : i64, scratch_operands = 0 : i64, tpu.core_type = #tpu.core_type<tc>, window_params = [{transform_indices = @transform_0, window_bounds = array<i64: 8, 256, 128>}, {pipeline_mode = #tpu.pipeline_mode<synchronous>, transform_indices = @transform_1, window_bounds = array<i64: 128, 128>}, {pipeline_mode = #tpu.pipeline_mode<synchronous>, transform_indices = @transform_2, window_bounds = array<i64: 1, 128>}, {pipeline_mode = #tpu.pipeline_mode<synchronous>, transform_indices = @transform_3, window_bounds = array<i64: 128, 512>}, {pipeline_mode = #tpu.pipeline_mode<synchronous>, transform_indices = @transform_4, window_bounds = array<i64: 1, 512>}, {pipeline_mode = #tpu.pipeline_mode<synchronous>, transform_indices = @transform_5, window_bounds = array<i64: 512, 256>}, {pipeline_mode = #tpu.pipeline_mode<synchronous>, transform_indices = @transform_6, window_bounds = array<i64: 1, 256>}, {transform_indices = @transform_7, window_bounds = array<i64: 8, 256>}]} {
    %c0 = arith.constant 0 : index
    %c0_0 = arith.constant 0 : index
    %c0_1 = arith.constant 0 : index
    %0 = vector.load %arg1[%c0, %c0_0, %c0_1] : memref<8x256x128xbf16, #tpu.memory_space<vmem>>, vector<8x256x128xbf16>
    %1 = vector.shape_cast %0 : vector<8x256x128xbf16> to vector<2048x128xbf16>
    %c0_2 = arith.constant 0 : index
    %c0_3 = arith.constant 0 : index
    %2 = vector.load %arg2[%c0_2, %c0_3] : memref<128x128xbf16, #tpu.memory_space<vmem>>, vector<128x128xbf16>
    %cst = arith.constant dense<0.000000e+00> : vector<2048x128xf32>
    %3 = tpu.matmul %1, %2, %cst {dimension_numbers = #tpu.dot_dimension_numbers<[1], [0], [0], [1], [0, 0, 1, 1], [], []>} : vector<2048x128xbf16>, vector<128x128xbf16>, vector<2048x128xf32> -> vector<2048x128xf32>
    %c0_4 = arith.constant 0 : index
    %c0_5 = arith.constant 0 : index
    %4 = vector.load %arg3[%c0_4, %c0_5] : memref<1x128xf32, #tpu.memory_space<vmem>>, vector<1x128xf32>
    %5 = vector.broadcast %4 : vector<1x128xf32> to vector<2048x128xf32>
    %6 = arith.addf %3, %5 : vector<2048x128xf32>
    %cst_6 = arith.constant 0.000000e+00 : f32
    %7 = vector.broadcast %cst_6 : f32 to vector<2048x128xf32>
    %8 = arith.maximumf %6, %7 : vector<2048x128xf32>
    %9 = vector.shape_cast %8 : vector<2048x128xf32> to vector<8x256x128xf32>
    %cst_7 = arith.constant dense<0.000000e+00> : vector<8x128xf32>
    %10 = vector.multi_reduction <add>, %9, %cst_7 [1] : vector<8x256x128xf32> to vector<8x128xf32>
    %11 = arith.truncf %10 : vector<8x128xf32> to vector<8x128xbf16>
    %c0_8 = arith.constant 0 : index
    %c0_9 = arith.constant 0 : index
    %12 = vector.load %arg4[%c0_8, %c0_9] : memref<128x512xbf16, #tpu.memory_space<vmem>>, vector<128x512xbf16>
    %cst_10 = arith.constant dense<0.000000e+00> : vector<8x512xf32>
    %13 = tpu.matmul %11, %12, %cst_10 {dimension_numbers = #tpu.dot_dimension_numbers<[1], [0], [0], [1], [0, 0, 1, 1], [], []>} : vector<8x128xbf16>, vector<128x512xbf16>, vector<8x512xf32> -> vector<8x512xf32>
    %c0_11 = arith.constant 0 : index
    %c0_12 = arith.constant 0 : index
    %14 = vector.load %arg5[%c0_11, %c0_12] : memref<1x512xf32, #tpu.memory_space<vmem>>, vector<1x512xf32>
    %15 = vector.broadcast %14 : vector<1x512xf32> to vector<8x512xf32>
    %16 = arith.addf %13, %15 : vector<8x512xf32>
    %17 = arith.truncf %16 : vector<8x512xf32> to vector<8x512xbf16>
    %c0_13 = arith.constant 0 : index
    %c0_14 = arith.constant 0 : index
    %18 = vector.load %arg6[%c0_13, %c0_14] : memref<512x256xbf16, #tpu.memory_space<vmem>>, vector<512x256xbf16>
    %cst_15 = arith.constant dense<0.000000e+00> : vector<8x256xf32>
    %19 = tpu.matmul %17, %18, %cst_15 {dimension_numbers = #tpu.dot_dimension_numbers<[1], [0], [0], [1], [0, 0, 1, 1], [], []>} : vector<8x512xbf16>, vector<512x256xbf16>, vector<8x256xf32> -> vector<8x256xf32>
    %c0_16 = arith.constant 0 : index
    %c0_17 = arith.constant 0 : index
    %20 = vector.load %arg7[%c0_16, %c0_17] : memref<1x256xf32, #tpu.memory_space<vmem>>, vector<1x256xf32>
    %21 = vector.broadcast %20 : vector<1x256xf32> to vector<8x256xf32>
    %22 = arith.addf %19, %21 : vector<8x256xf32>
    %23 = arith.mulf %22, %22 : vector<8x256xf32>
    %cst_18 = arith.constant dense<0.000000e+00> : vector<8xf32>
    %24 = vector.multi_reduction <add>, %23, %cst_18 [1] : vector<8x256xf32> to vector<8xf32>
    %25 = vector.shape_cast %24 : vector<8xf32> to vector<8x1xf32>
    %cst_19 = arith.constant 1.000000e-10 : f32
    %26 = vector.broadcast %cst_19 : f32 to vector<8x1xf32>
    %27 = arith.addf %25, %26 : vector<8x1xf32>
    %28 = math.rsqrt %27 : vector<8x1xf32>
    %29 = vector.broadcast %28 : vector<8x1xf32> to vector<8x256xf32>
    %30 = arith.mulf %22, %29 : vector<8x256xf32>
    %cst_20 = arith.constant 1.000000e+01 : f32
    %31 = vector.broadcast %cst_20 : f32 to vector<8x256xf32>
    %32 = arith.mulf %30, %31 : vector<8x256xf32>
    %c0_21 = arith.constant 0 : index
    %c0_22 = arith.constant 0 : index
    %33 = vector.load %arg8[%c0_21, %c0_22] : memref<8x256xf32, #tpu.memory_space<vmem>>, vector<8x256xf32>
    tpu.vector_store %arg8[%c0_21, %c0_22], %32 {strides = array<i32>} : memref<8x256xf32, #tpu.memory_space<vmem>>, vector<8x256xf32>,
    return
  }
  func.func @transform_0(%arg0: i32) -> (i32, i32, i32) {
    %c0_i32 = arith.constant 0 : i32
    %c0_i32_0 = arith.constant 0 : i32
    %c0_i32_1 = arith.constant 0 : i32
    return %arg0, %c0_i32, %c0_i32_0 : i32, i32, i32
  }
  func.func @transform_1(%arg0: i32) -> (i32, i32) {
    %c0_i32 = arith.constant 0 : i32
    %c0_i32_0 = arith.constant 0 : i32
    %c0_i32_1 = arith.constant 0 : i32
    return %c0_i32, %c0_i32_0 : i32, i32
  }
  func.func @transform_2(%arg0: i32) -> (i32, i32) {
    %c0_i32 = arith.constant 0 : i32
    %c0_i32_0 = arith.constant 0 : i32
    %c0_i32_1 = arith.constant 0 : i32
    return %c0_i32, %c0_i32_0 : i32, i32
  }
  func.func @transform_3(%arg0: i32) -> (i32, i32) {
    %c0_i32 = arith.constant 0 : i32
    %c0_i32_0 = arith.constant 0 : i32
    %c0_i32_1 = arith.constant 0 : i32
    return %c0_i32, %c0_i32_0 : i32, i32
  }
  func.func @transform_4(%arg0: i32) -> (i32, i32) {
    %c0_i32 = arith.constant 0 : i32
    %c0_i32_0 = arith.constant 0 : i32
    %c0_i32_1 = arith.constant 0 : i32
    return %c0_i32, %c0_i32_0 : i32, i32
  }
  func.func @transform_5(%arg0: i32) -> (i32, i32) {
    %c0_i32 = arith.constant 0 : i32
    %c0_i32_0 = arith.constant 0 : i32
    %c0_i32_1 = arith.constant 0 : i32
    return %c0_i32, %c0_i32_0 : i32, i32
  }
  func.func @transform_6(%arg0: i32) -> (i32, i32) {
    %c0_i32 = arith.constant 0 : i32
    %c0_i32_0 = arith.constant 0 : i32
    %c0_i32_1 = arith.constant 0 : i32
    return %c0_i32, %c0_i32_0 : i32, i32
  }
  func.func @transform_7(%arg0: i32) -> (i32, i32) {
    %c0_i32 = arith.constant 0 : i32
    %c0_i32_0 = arith.constant 0 : i32
    return %arg0, %c0_i32 : i32, i32
  }
}

</mosaic_0001>

<bundles_post_ra>
// kernel: facenet_forward.1
= control target key start
LH: loop header
LB: loop body
LE: loop exit
PB: predicated region body
PF: predicated region fallthrough
CT: control target
= control target key end

     0   :  { %12 = vsyncpa [#allocation3], 0  ;;  %s5926_s0 = inlined_call_operand.vmem [shape: bf16[16,256,128], index: 0, kind: input, shape index: {}]   ;;  %s5927_s1 = inlined_call_operand.vmem [shape: bf16[128,128], index: 1, kind: input, shape index: {}]   ;;  %s5928_s2 = inlined_call_operand.vmem [shape: f32[1,128], index: 2, kind: input, shape index: {}]   ;;  %s5929_s3 = inlined_call_operand.vmem [shape: bf16[128,512], index: 3, kind: input, shape index: {}]   ;;  %s5930_s4 = inlined_call_operand.vmem [shape: f32[1,512], index: 4, kind: input, shape index: {}]   ;;  %s5931_s5 = inlined_call_operand.vmem [shape: bf16[512,256], index: 5, kind: input, shape index: {}]   ;;  %s5932_s6 = inlined_call_operand.vmem [shape: f32[1,256], index: 6, kind: input, shape index: {}]   ;;  %s5933_s7 = inlined_call_operand.hbm [shape: f32[16,256], index: 7, kind: output, shape index: {}]  }
   0x1   :  { %14 = vsyncpa [#allocation3 + $0x1], 0  ;;  %s5000_s24 = smov 0   ;;  %s5002_s25 = smov 0  }
   0x2   :  { %s5004_s26 = smov 0   ;;  %s5006_s27 = smov 0  }
   0x3 LB: > { %s5021_s28 = sadd.s32 4294967295, %s4956_s27   ;;  %s3892_s29 = sadd.s32 4294967294, %s4956_s27   ;;  %s4956_s27 = sphi %s5006_s27, %s5939_s27   ;;  %s4952_s26 = sphi %s5004_s26, %s5938_s26   ;;  %s4948_s25 = sphi %s5002_s25, %s5937_s25   ;;  %s4944_s24 = sphi %s5000_s24, %s5936_s24  }
   0x4   : > { %s5025_s30 = sadd.s32 1, %s4956_s27   ;;  %s179_s8 = sadd.s32 1, %s4952_s26 }
   0x5   : > { %s176_s9 = ssub.s32 %s4956_s27, %s5025_s30  ;;  %p189_p0 = scmp.ne.s32.totalorder %s4952_s26, %s4948_s25 }
   0x6   : > { %p177_p1 = scmp.eq.s32.totalorder %s176_s9, 0  ;;  %p190_p2 = scmp.eq.s32.totalorder %s5021_s28, 1 }
   0x7   : > { %p195_p3 = scmp.ne.s32.totalorder %s4948_s25, %s4944_s24  ;;  %p196_p4 = scmp.eq.s32.totalorder %s3892_s29, 1 }
   0x8   : > { %s5036_s10 = scalar_select %p177_p1, %s4952_s26, %s179_s8  }
   0x9   : > { %p5038_p5 = por %p190_p2, %p189_p0  ;;  %p5042_p6 = por %p196_p4, %p195_p3 }
   0xa   : > { %p3895_p7 = scmp.ge.s32.totalorder %s4956_s27, 1  ;;  %p242_p8 = scmp.lt.s32.totalorder %s4956_s27, 3 }
   0xc   : > { %p243_p9 = pnand %p3895_p7, %p242_p8 }
   0xd   : > { %v4610_v0 = vld [vmem:[%s5927_s1] sm:$0xff] (!%p243_p9)   ;;  %s3897_s15 = sshll.u32 (!%p243_p9), %s5021_s28, 3  ;;  %v4611_v1 = vld [vmem:[%s5927_s1 + $0x8] sm:$0xff] (!%p243_p9)   ;;  %v4612_v2 = vld [vmem:[%s5927_s1 + $0x10] sm:$0xff] (!%p243_p9)   ;;  %vm3065_vm0 = vcmask (!%p243_p9), 1041409   ;;  %vm3067_vm1 = vcmask (!%p243_p9), 1042434  }
   0xe   : > { %246 = sbr.rel (%p243_p9) target bundleno = 1342 (0x53e), region = 48  ;;  %p276_p10 = scmp.lt.s32.totalorder (!%p243_p9), %s3897_s15, 15  ;;  %4276 = vmatprep.subr.bf16.mxu0 (!%p243_p9), %v4610_v0  ;;  %4548 = vmatprep.subr.bf16.mxu1 (!%p243_p9), %v4610_v0  ;;  %v4613_v3 = vld [vmem:[%s5927_s1 + $0x18] sm:$0xff] (!%p243_p9)   ;;  %v4614_v5 = vld [vmem:[%s5927_s1 + $0x20] sm:$0xff] (!%p243_p9)   ;;  %v4615_v6 = vld [vmem:[%s5927_s1 + $0x28] sm:$0xff] (!%p243_p9)   ;;  %vm3069_vm2 = vcmask (!%p243_p9), 1043459  }
   0xf   : > { %4277 = vmatpush3.bf16.msra.mxu0 (!%p243_p9), %v4610_v0  ;;  %4556 = vmatpush3.bf16.msra.mxu1 (!%p243_p9), %v4610_v0  ;;  %v4616_v7 = vld [vmem:[%s5927_s1 + $0x30] sm:$0xff] (!%p243_p9)   ;;  %v4617_v8 = vld [vmem:[%s5927_s1 + $0x38] sm:$0xff] (!%p243_p9)   ;;  %vm3071_vm3 = vcmask (!%p243_p9), 1044484   ;;  %vm3073_vm4 = vcmask (!%p243_p9), 1045509   ;;  %vm3075_vm5 = vcmask (!%p243_p9), 1046534   ;;  %vm3077_vm6 = vcmask (!%p243_p9), 1047559  }
  0x10   : > { %4278 = vmatprep.subr.bf16.mxu0 (!%p243_p9), %v4611_v1  ;;  %4549 = vmatprep.subr.bf16.mxu1 (!%p243_p9), %v4611_v1  ;;  %s4139_s14 = sshll.u32 (!%p243_p9), %s5021_s28, 8  ;;  %s4959_s21 = smov (!%p243_p9), [#allocation2]  }
  0x11   : > { %s5884_s19 = scalar_lea.hbm (!%p243_p9), %s5933_s7, %s4139_s14  ;;  %s4898_s22 = sshll.u32 (!%p243_p9), %s4959_s21, 4  ;;  %s4899_s22 = int_to_ptr.vmem [resolvable:$false] %s4898_s22 }
  0x12   : > { %s4900_s29 = scalar_lea.vmem (!%p243_p9), %s4899_s22, 512 }
  0x13   : > { %4279 = vmatpush3.bf16.msra.mxu0 (!%p243_p9), %v4611_v1  ;;  %4557 = vmatpush3.bf16.msra.mxu1 (!%p243_p9), %v4611_v1 }
  0x14   : > { %4280 = vmatprep.subr.bf16.mxu0 (!%p243_p9), %v4612_v2  ;;  %4550 = vmatprep.subr.bf16.mxu1 (!%p243_p9), %v4612_v2 }
  0x15   : > { %s5941_s15 = smov (!%p276_p10, %s3897_s15), 15 }
  0x16   : > { %s4138_s20 = sshll.u32 %s5941_s15, 7 }
  0x17   : > { %s5061_s23 = scalar_lea.vmem %s5926_s0, %s4138_s20  ;;  %4281 = vmatpush3.bf16.msra.mxu0 %v4612_v2  ;;  %4558 = vmatpush3.bf16.msra.mxu1 %v4612_v2 }
  0x18   : > { %v4618_v4 = vld [vmem:[%s5061_s23] sm:$0xff]   ;;  %4282 = vmatprep.subr.bf16.mxu0 %v4613_v3  ;;  %4551 = vmatprep.subr.bf16.mxu1 %v4613_v3  ;;  %v4619_v9 = vld [vmem:[%s5061_s23 + $0x8] sm:$0xff]   ;;  %v4620_v10 = vld [vmem:[%s5061_s23 + $0x10] sm:$0xff]  }
  0x19   : > { %4292 = vmatprep.mubr.bf16.mxu0 %v4618_v4  ;;  %v4621_v11 = vld [vmem:[%s5061_s23 + $0x18] sm:$0xff]   ;;  %v4622_v12 = vld [vmem:[%s5061_s23 + $0x20] sm:$0xff]   ;;  %v4623_v13 = vld [vmem:[%s5061_s23 + $0x28] sm:$0xff]  }
  0x1a   : > { %v4624_v14 = vld [vmem:[%s5061_s23 + $0x30] sm:$0xff]   ;;  %v4625_v15 = vld [vmem:[%s5061_s23 + $0x38] sm:$0xff]   ;;  %v4626_v16 = vld [vmem:[%s5061_s23 + $0x40] sm:$0xff]  }
  0x1b   : > { %4283 = vmatpush3.bf16.msra.mxu0 %v4613_v3  ;;  %4559 = vmatpush3.bf16.msra.mxu1 %v4613_v3  ;;  %v4627_v17 = vld [vmem:[%s5061_s23 + $0x48] sm:$0xff]   ;;  %v4628_v18 = vld [vmem:[%s5061_s23 + $0x50] sm:$0xff]   ;;  %v4629_v19 = vld [vmem:[%s5061_s23 + $0x58] sm:$0xff]  }
  0x1c   : > { %4284 = vmatprep.subr.bf16.mxu0 %v4614_v5  ;;  %4552 = vmatprep.subr.bf16.mxu1 %v4614_v5  ;;  %v4630_v20 = vld [vmem:[%s5061_s23 + $0x60] sm:$0xff]   ;;  %v4631_v21 = vld [vmem:[%s5061_s23 + $0x68] sm:$0xff]   ;;  %v4632_v22 = vld [vmem:[%s5061_s23 + $0x70] sm:$0xff]  }
  0x1d   : > { %v4633_v23 = vld [vmem:[%s5061_s23 + $0x78] sm:$0xff]   ;;  %v4634_v24 = vld [vmem:[%s5061_s23 + $0x80] sm:$0xff]   ;;  %v4635_v25 = vld [vmem:[%s5061_s23 + $0x88] sm:$0xff]  }
  0x1e   : > { %v4636_v26 = vld [vmem:[%s5061_s23 + $0x90] sm:$0xff]   ;;  %v4637_v27 = vld [vmem:[%s5061_s23 + $0x98] sm:$0xff]   ;;  %v4638_v28 = vld [vmem:[%s5061_s23 + $0xa0] sm:$0xff]  }
  0x1f   : > { %4285 = vmatpush3.bf16.msra.mxu0 %v4614_v5  ;;  %4560 = vmatpush3.bf16.msra.mxu1 %v4614_v5  ;;  %v4670_v29 = vld [vmem:[%s5061_s23 + $0x2b0] sm:$0xff]   ;;  %v4671_v30 = vld [vmem:[%s5061_s23 + $0x2b8] sm:$0xff]   ;;  %v4639_v31 = vld [vmem:[%s5061_s23 + $0xa8] sm:$0xff]  }
  0x20   : > { %4286 = vmatprep.subr.bf16.mxu0 %v4615_v6  ;;  %4553 = vmatprep.subr.bf16.mxu1 %v4615_v6  ;;  %v4640_v32 = vld [vmem:[%s5061_s23 + $0xb0] sm:$0xff]   ;;  %v4674_v33 = vld [vmem:[%s5061_s23 + $0x2c0] sm:$0xff]   ;;  %v4641_v34 = vld [vmem:[%s5061_s23 + $0xb8] sm:$0xff]  }
  0x21   : > { %4464 = vmatprep.mubr.bf16.mxu1 %v4670_v29  ;;  %v4675_v35 = vld [vmem:[%s5061_s23 + $0x2c8] sm:$0xff]   ;;  %v4642_v36 = vld [vmem:[%s5061_s23 + $0xc0] sm:$0xff]   ;;  %v4678_v38 = vld [vmem:[%s5061_s23 + $0x2d0] sm:$0xff]  }
  0x22   : > { %v4643_v37 = vld [vmem:[%s5061_s23 + $0xc8] sm:$0xff]   ;;  %v4679_v39 = vld [vmem:[%s5061_s23 + $0x2d8] sm:$0xff]   ;;  %v4644_v40 = vld [vmem:[%s5061_s23 + $0xd0] sm:$0xff]  }
  0x23   : > { %4287 = vmatpush3.bf16.msra.mxu0 %v4615_v6  ;;  %4561 = vmatpush3.bf16.msra.mxu1 %v4615_v6  ;;  %v4645_v41 = vld [vmem:[%s5061_s23 + $0xd8] sm:$0xff]   ;;  %v4682_v42 = vld [vmem:[%s5061_s23 + $0x2e0] sm:$0xff]   ;;  %v4683_v43 = vld [vmem:[%s5061_s23 + $0x2e8] sm:$0xff]  }
  0x24   : > { %4288 = vmatprep.subr.bf16.mxu0 %v4616_v7  ;;  %4554 = vmatprep.subr.bf16.mxu1 %v4616_v7  ;;  %v4646_v44 = vld [vmem:[%s5061_s23 + $0xe0] sm:$0xff]   ;;  %v4647_v45 = vld [vmem:[%s5061_s23 + $0xe8] sm:$0xff]   ;;  %v4686_v46 = vld [vmem:[%s5061_s23 + $0x2f0] sm:$0xff]  }
  0x25   : > { %v4687_v47 = vld [vmem:[%s5061_s23 + $0x2f8] sm:$0xff]   ;;  %v4648_v48 = vld [vmem:[%s5061_s23 + $0xf0] sm:$0xff]   ;;  %v4690_v49 = vld [vmem:[%s5061_s23 + $0x300] sm:$0xff]  }
  0x26   : > { %v4691_v50 = vld [vmem:[%s5061_s23 + $0x308] sm:$0xff]   ;;  %v4649_v51 = vld [vmem:[%s5061_s23 + $0xf8] sm:$0xff]   ;;  %v4650_v52 = vld [vmem:[%s5061_s23 + $0x100] sm:$0xff]  }
  0x27   : > { %4289 = vmatpush3.bf16.msra.mxu0 %v4616_v7  ;;  %4562 = vmatpush3.bf16.msra.mxu1 %v4616_v7  ;;  %v4694_v53 = vld [vmem:[%s5061_s23 + $0x310] sm:$0xff]   ;;  %v4695_v54 = vld [vmem:[%s5061_s23 + $0x318] sm:$0xff]   ;;  %v4651_v55 = vld [vmem:[%s5061_s23 + $0x108] sm:$0xff]  }
  0x28   : > { %4290 = vmatprep.subr.bf16.mxu0 %v4617_v8  ;;  %4555 = vmatprep.subr.bf16.mxu1 %v4617_v8  ;;  %v4652_v56 = vld [vmem:[%s5061_s23 + $0x110] sm:$0xff]   ;;  %v4698_v57 = vld [vmem:[%s5061_s23 + $0x320] sm:$0xff]   ;;  %v4699_v58 = vld [vmem:[%s5061_s23 + $0x328] sm:$0xff]  }
  0x29   : > { %v4653_v59 = vld [vmem:[%s5061_s23 + $0x118] sm:$0xff]   ;;  %v4654_v60 = vld [vmem:[%s5061_s23 + $0x120] sm:$0xff]   ;;  %v4702_v61 = vld [vmem:[%s5061_s23 + $0x330] sm:$0xff]  }
  0x2a   : > { %v4703_v62 = vld [vmem:[%s5061_s23 + $0x338] sm:$0xff]   ;;  %v4655_v63 = vld [vmem:[%s5061_s23 + $0x128] sm:$0xff]   ;;  %v4656_v0 = vld [vmem:[%s5061_s23 + $0x130] sm:$0xff]  }
  0x2b   : > { %4291 = vmatpush3.bf16.msra.mxu0 %v4617_v8  ;;  %4563 = vmatpush3.bf16.msra.mxu1 %v4617_v8  ;;  %v4706_v1 = vld [vmem:[%s5061_s23 + $0x340] sm:$0xff]   ;;  %v4707_v2 = vld [vmem:[%s5061_s23 + $0x348] sm:$0xff]   ;;  %v4657_v3 = vld [vmem:[%s5061_s23 + $0x138] sm:$0xff]  }
  0x2c   : > { %v4658_v4 = vld [vmem:[%s5061_s23 + $0x140] sm:$0xff]   ;;  %v4710_v5 = vld [vmem:[%s5061_s23 + $0x350] sm:$0xff]   ;;  %v4711_v6 = vld [vmem:[%s5061_s23 + $0x358] sm:$0xff]  }
  0x2d   : > { %v4659_v7 = vld [vmem:[%s5061_s23 + $0x148] sm:$0xff]   ;;  %v4660_v8 = vld [vmem:[%s5061_s23 + $0x150] sm:$0xff]  }
  0x2e   : > { %4293 = vmatmul.mubr.bf16.vlgmr.msra.gmra.mrb[0].mxu0 %v4619_v9  ;;  %4465 = vmatmul.mubr.bf16.vlgmr.msra.gmra.mrb[0].mxu1 %v4671_v30  ;;  %v4714_v9 = vld [vmem:[%s5061_s23 + $0x360] sm:$0xff]   ;;  %v4734_v29 = vld [vmem:[%s5061_s23 + $0x3b0] sm:$0xff]   ;;  %v4735_v30 = vld [vmem:[%s5061_s23 + $0x3b8] sm:$0xff]  }
  0x2f   : > { %4296 = vmatprep.mubr.bf16.mxu0 %v4620_v10  ;;  %4468 = vmatprep.mubr.bf16.mxu1 %v4674_v33  ;;  %v4715_v10 = vld [vmem:[%s5061_s23 + $0x368] sm:$0xff]   ;;  %v5170_v33 = vld [vmem:[%s5928_s2] ss:$0 sm:$0xff] }
  0x36   : > { %4297 = vmatmul.mubr.bf16.gmra.mrb[4].mxu0 %v4621_v11  ;;  %4469 = vmatmul.mubr.bf16.gmra.mrb[4].mxu1 %v4675_v35  ;;  %v4661_v11 = vld [vmem:[%s5061_s23 + $0x158] sm:$0xff]  }
  0x37   : > { %4300 = vmatprep.mubr.bf16.mxu0 %v4622_v12  ;;  %4472 = vmatprep.mubr.bf16.mxu1 %v4678_v38  ;;  %v4662_v12 = vld [vmem:[%s5061_s23 + $0x160] sm:$0xff]   ;;  %v4677_v38 = vld [vmem:[%s5061_s23 + $0x1b8] sm:$0xff]  }
  0x3e   : > { %4301 = vmatmul.mubr.bf16.gmra.mrb[8].mxu0 %v4623_v13  ;;  %4473 = vmatmul.mubr.bf16.gmra.mrb[8].mxu1 %v4679_v39  ;;  %v4718_v13 = vld [vmem:[%s5061_s23 + $0x370] sm:$0xff]  }
  0x3f   : > { %4304 = vmatprep.mubr.bf16.mxu0 %v4624_v14  ;;  %4476 = vmatprep.mubr.bf16.mxu1 %v4682_v42  ;;  %v4719_v14 = vld [vmem:[%s5061_s23 + $0x378] sm:$0xff]  }
  0x46   : > { %4305 = vmatmul.mubr.bf16.gmra.mrb[12].mxu0 %v4625_v15  ;;  %4477 = vmatmul.mubr.bf16.gmra.mrb[12].mxu1 %v4683_v43  ;;  %v4663_v15 = vld [vmem:[%s5061_s23 + $0x168] sm:$0xff]  }
  0x47   : > { %4308 = vmatprep.mubr.bf16.mxu0 %v4626_v16  ;;  %4480 = vmatprep.mubr.bf16.mxu1 %v4686_v46  ;;  %v4664_v16 = vld [vmem:[%s5061_s23 + $0x170] sm:$0xff]  }
  0x4e   : > { %4309 = vmatmul.mubr.bf16.gmra.mrb[16].mxu0 %v4627_v17  ;;  %4481 = vmatmul.mubr.bf16.gmra.mrb[16].mxu1 %v4687_v47  ;;  %v4722_v17 = vld [vmem:[%s5061_s23 + $0x380] sm:$0xff]  }
  0x4f   : > { %4312 = vmatprep.mubr.bf16.mxu0 %v4628_v18  ;;  %4484 = vmatprep.mubr.bf16.mxu1 %v4690_v49  ;;  %v4723_v18 = vld [vmem:[%s5061_s23 + $0x388] sm:$0xff]  }
  0x56   : > { %4313 = vmatmul.mubr.bf16.gmra.mrb[20].mxu0 %v4629_v19  ;;  %4485 = vmatmul.mubr.bf16.gmra.mrb[20].mxu1 %v4691_v50  ;;  %v4665_v19 = vld [vmem:[%s5061_s23 + $0x178] sm:$0xff]  }
  0x57   : > { %4316 = vmatprep.mubr.bf16.mxu0 %v4630_v20  ;;  %4488 = vmatprep.mubr.bf16.mxu1 %v4694_v53  ;;  %v4666_v20 = vld [vmem:[%s5061_s23 + $0x180] sm:$0xff]  }
  0x5e   : > { %4317 = vmatmul.mubr.bf16.gmra.mrb[24].mxu0 %v4631_v21  ;;  %4489 = vmatmul.mubr.bf16.gmra.mrb[24].mxu1 %v4695_v54  ;;  %v4726_v21 = vld [vmem:[%s5061_s23 + $0x390] sm:$0xff]   ;;  %v4681_v54 = vld [vmem:[%s5061_s23 + $0x1c8] sm:$0xff]  }
  0x5f   : > { %4320 = vmatprep.mubr.bf16.mxu0 %v4632_v22  ;;  %4492 = vmatprep.mubr.bf16.mxu1 %v4698_v57  ;;  %v4727_v22 = vld [vmem:[%s5061_s23 + $0x398] sm:$0xff]  }
  0x66   : > { %4321 = vmatmul.mubr.bf16.gmra.mrb[28].mxu0 %v4633_v23  ;;  %4493 = vmatmul.mubr.bf16.gmra.mrb[28].mxu1 %v4699_v58  ;;  %v4667_v23 = vld [vmem:[%s5061_s23 + $0x188] sm:$0xff]  }
  0x67   : > { %4324 = vmatprep.mubr.bf16.mxu0 %v4634_v24  ;;  %4496 = vmatprep.mubr.bf16.mxu1 %v4702_v61  ;;  %v4668_v24 = vld [vmem:[%s5061_s23 + $0x190] sm:$0xff]  }
  0x6e   : > { %4325 = vmatmul.mubr.bf16.gmra.mrb[32].mxu0 %v4635_v25  ;;  %4497 = vmatmul.mubr.bf16.gmra.mrb[32].mxu1 %v4703_v62  ;;  %v4730_v25 = vld [vmem:[%s5061_s23 + $0x3a0] sm:$0xff]  }
  0x6f   : > { %4328 = vmatprep.mubr.bf16.mxu0 %v4636_v26  ;;  %4500 = vmatprep.mubr.bf16.mxu1 %v4706_v1  ;;  %v4731_v26 = vld [vmem:[%s5061_s23 + $0x3a8] sm:$0xff]  }
  0x76   : > { %4329 = vmatmul.mubr.bf16.gmra.mrb[36].mxu0 %v4637_v27  ;;  %4501 = vmatmul.mubr.bf16.gmra.mrb[36].mxu1 %v4707_v2  ;;  %v4669_v27 = vld [vmem:[%s5061_s23 + $0x198] sm:$0xff]  }
  0x77   : > { %4332 = vmatprep.mubr.bf16.mxu0 %v4638_v28  ;;  %4504 = vmatprep.mubr.bf16.mxu1 %v4710_v5  ;;  %v4672_v28 = vld [vmem:[%s5061_s23 + $0x1a0] sm:$0xff]  }
  0x7e   : > { %4333 = vmatmul.mubr.bf16.gmra.mrb[40].mxu0 %v4639_v31  ;;  %4505 = vmatmul.mubr.bf16.gmra.mrb[40].mxu1 %v4711_v6  ;;  %v4673_v31 = vld [vmem:[%s5061_s23 + $0x1a8] sm:$0xff]  }
  0x7f   : > { %4336 = vmatprep.mubr.bf16.mxu0 %v4640_v32  ;;  %4508 = vmatprep.mubr.bf16.mxu1 %v4714_v9  ;;  %v4676_v32 = vld [vmem:[%s5061_s23 + $0x1b0] sm:$0xff]  }
  0x86   : > { %4337 = vmatmul.mubr.bf16.gmra.mrb[44].mxu0 %v4641_v34  ;;  %4509 = vmatmul.mubr.bf16.gmra.mrb[44].mxu1 %v4715_v10  ;;  %v4738_v34 = vld [vmem:[%s5061_s23 + $0x3c0] sm:$0xff]   ;;  %v4685_v10 = vld [vmem:[%s5061_s23 + $0x1d8] sm:$0xff]  }
  0x87   : > { %4340 = vmatprep.mubr.bf16.mxu0 %v4642_v36  ;;  %4512 = vmatprep.mubr.bf16.mxu1 %v4718_v13  ;;  %v4739_v36 = vld [vmem:[%s5061_s23 + $0x3c8] sm:$0xff]  }
  0x8e   : > { %4341 = vmatmul.mubr.bf16.gmra.mrb[48].mxu0 %v4643_v37  ;;  %4513 = vmatmul.mubr.bf16.gmra.mrb[48].mxu1 %v4719_v14 }
  0x8f   : > { %4344 = vmatprep.mubr.bf16.mxu0 %v4644_v40  ;;  %4516 = vmatprep.mubr.bf16.mxu1 %v4722_v17 }
  0x96   : > { %4345 = vmatmul.mubr.bf16.gmra.mrb[52].mxu0 %v4645_v41  ;;  %4517 = vmatmul.mubr.bf16.gmra.mrb[52].mxu1 %v4723_v18  ;;  %v4680_v41 = vld [vmem:[%s5061_s23 + $0x1c0] sm:$0xff]  }
  0x97   : > { %4348 = vmatprep.mubr.bf16.mxu0 %v4646_v44  ;;  %4520 = vmatprep.mubr.bf16.mxu1 %v4726_v21 }
  0x9e   : > { %4349 = vmatmul.mubr.bf16.gmra.mrb[56].mxu0 %v4647_v45  ;;  %4521 = vmatmul.mubr.bf16.gmra.mrb[56].mxu1 %v4727_v22 }
  0x9f   : > { %4352 = vmatprep.mubr.bf16.mxu0 %v4648_v48  ;;  %4524 = vmatprep.mubr.bf16.mxu1 %v4730_v25  ;;  %v4740_v48 = vld [vmem:[%s5061_s23 + $0x3d0] sm:$0xff]  }
  0xa6   : > { %4353 = vmatmul.mubr.bf16.gmra.mrb[60].mxu0 %v4649_v51  ;;  %4525 = vmatmul.mubr.bf16.gmra.mrb[60].mxu1 %v4731_v26 }
  0xa7   : > { %4356 = vmatprep.mubr.bf16.mxu0 %v4650_v52  ;;  %4528 = vmatprep.mubr.bf16.mxu1 %v4734_v29  ;;  %v4741_v52 = vld [vmem:[%s5061_s23 + $0x3d8] sm:$0xff]  }
  0xae   : > { %4357 = vmatmul.mubr.bf16.gmra.mrb[64].mxu0 %v4651_v55  ;;  %4529 = vmatmul.mubr.bf16.gmra.mrb[64].mxu1 %v4735_v30  ;;  %v4689_v30 = vld [vmem:[%s5061_s23 + $0x1e8] sm:$0xff]  }
  0xaf   : > { %4360 = vmatprep.mubr.bf16.mxu0 %v4652_v56  ;;  %4532 = vmatprep.mubr.bf16.mxu1 %v4738_v34 }
  0xb6   : > { %4361 = vmatmul.mubr.bf16.gmra.mrb[68].mxu0 %v4653_v59  ;;  %4533 = vmatmul.mubr.bf16.gmra.mrb[68].mxu1 %v4739_v36  ;;  %v4684_v59 = vld [vmem:[%s5061_s23 + $0x1d0] sm:$0xff]  }
  0xb7   : > { %4364 = vmatprep.mubr.bf16.mxu0 %v4654_v60  ;;  %4536 = vmatprep.mubr.bf16.mxu1 %v4740_v48  ;;  %v4692_v36 = vld [vmem:[%s5061_s23 + $0x1f0] sm:$0xff]  }
  0xbe   : > { %4365 = vmatmul.mubr.bf16.gmra.mrb[72].mxu0 %v4655_v63  ;;  %4537 = vmatmul.mubr.bf16.gmra.mrb[72].mxu1 %v4741_v52 }
  0xbf   : > { %4368 = vmatprep.mubr.bf16.mxu0 %v4656_v0 }
  0xc6   : > { %4369 = vmatmul.mubr.bf16.gmra.mrb[76].mxu0 %v4657_v3 }
  0xc7   : > { %4372 = vmatprep.mubr.bf16.mxu0 %v4658_v4  ;;  %v4742_v4 = vld [vmem:[%s5061_s23 + $0x3e0] sm:$0xff]  }
  0xc8   : > { %4540 = vmatprep.mubr.bf16.mxu1 %v4742_v4 }
  0xce   : > { %4373 = vmatmul.mubr.bf16.gmra.mrb[80].mxu0 %v4659_v7 }
  0xcf   : > { %4376 = vmatprep.mubr.bf16.mxu0 %v4660_v8  ;;  %v4743_v8 = vld [vmem:[%s5061_s23 + $0x3e8] sm:$0xff]  }
  0xd0   : > { %4541 = vmatmul.mubr.bf16.gmra.mrb[76].mxu1 %v4743_v8  ;;  %v4700_v8 = vld [vmem:[%s5061_s23 + $0x210] sm:$0xff]  }
  0xd6   : > { %4377 = vmatmul.mubr.bf16.gmra.mrb[84].mxu0 %v4661_v11 }
  0xd7   : > { %4380 = vmatprep.mubr.bf16.mxu0 %v4662_v12 }
  0xde   : > { %4381 = vmatmul.mubr.bf16.gmra.mrb[88].mxu0 %v4663_v15  ;;  %v4688_v15 = vld [vmem:[%s5061_s23 + $0x1e0] sm:$0xff]  }
  0xdf   : > { %4384 = vmatprep.mubr.bf16.mxu0 %v4664_v16 }
  0xe6   : > { %4385 = vmatmul.mubr.bf16.gmra.mrb[92].mxu0 %v4665_v19 }
  0xe7   : > { %4388 = vmatprep.mubr.bf16.mxu0 %v4666_v20 }
  0xee   : > { %4389 = vmatmul.mubr.bf16.gmra.mrb[96].mxu0 %v4667_v23 }
  0xef   : > { %4392 = vmatprep.mubr.bf16.mxu0 %v4668_v24  ;;  %v4744_v24 = vld [vmem:[%s5061_s23 + $0x3f0] sm:$0xff]  }
  0xf0   : > { %4544 = vmatprep.mubr.bf16.mxu1 %v4744_v24 }
  0xf6   : > { %4393 = vmatmul.mubr.bf16.gmra.mrb[100].mxu0 %v4669_v27 }
  0xf7   : > { %4396 = vmatprep.mubr.bf16.mxu0 %v4672_v28  ;;  %v4745_v28 = vld [vmem:[%s5061_s23 + $0x3f8] sm:$0xff]  }
  0xf8   : > { %4545 = vmatmul.mubr.bf16.gmra.mrb[80].mxu1 %v4745_v28 }
  0xfe   : > { %4397 = vmatmul.mubr.bf16.gmra.mrb[104].mxu0 %v4673_v31 }
  0xff   : > { %4400 = vmatprep.mubr.bf16.mxu0 %v4676_v32 }
 0x101   : > { %v4294_v35 = vpop.f32.mrb[0].mxu0 }
 0x102   : > { %v1412_v37 = vpop.f32.mrb[1].mxu0  ;;  %v1421_v43 = vadd.f32 %v4294_v35, %v5170_v33 }
 0x103   : > { %v1413_v39 = vadd.f32 %v5170_v33, %v1412_v37  ;;  %v4295_v40 = vpop.f32.mrb[2].mxu0 }
 0x104   : > { %v1415_v42 = vpop.f32.mrb[3].mxu0  ;;  %v1424_v46 = vadd.f32 %v4295_v40, %v5170_v33  ;;  %v2437_v49 = vmax.f32 %v1421_v43, 0.0 }
 0x105   : > { %v1416_v44 = vadd.f32 %v5170_v33, %v1415_v42  ;;  %v2435_v45 = vmax.f32 %v1413_v39, 0.0 }
 0x106   : > { %4401 = vmatmul.mubr.bf16.gmra.mrb[108].mxu0 %v4677_v38  ;;  %v2438_v55 = vmax.f32 %v1424_v46, 0.0 }
 0x107   : > { %v2436_v47 = vmax.f32 %v1416_v44, 0.0  ;;  %4404 = vmatprep.mubr.bf16.mxu0 %v4680_v41 }
 0x109   : > { %v2691_v50 = vadd.f32 %v2436_v47, %v2435_v45  ;;  %v4298_v51 = vpop.f32.mrb[4].mxu0 }
 0x10a   : > { %v1428_v53 = vpop.f32.mrb[5].mxu0  ;;  %v1437_v61 = vadd.f32 %v4298_v51, %v5170_v33 }
 0x10b   : > { %v2692_v56 = vadd.f32 %v2691_v50, %v2437_v49  ;;  %v1429_v57 = vadd.f32 %v5170_v33, %v1428_v53  ;;  %v4299_v58 = vpop.f32.mrb[6].mxu0  ;;  %v4693_v49 = vld [vmem:[%s5061_s23 + $0x1f8] sm:$0xff]  }
 0x10c   : > { %v1431_v60 = vpop.f32.mrb[7].mxu0  ;;  %v1440_v2 = vadd.f32 %v4299_v58, %v5170_v33  ;;  %v2441_v5 = vmax.f32 %v1437_v61, 0.0 }
 0x10d   : > { %v2439_v62 = vmax.f32 %v1429_v57, 0.0  ;;  %v2693_v63 = vadd.f32 %v2692_v56, %v2438_v55  ;;  %v1432_v0 = vadd.f32 %v5170_v33, %v1431_v60 }
 0x10e   : > { %4405 = vmatmul.mubr.bf16.gmra.mrb[112].mxu0 %v4681_v54  ;;  %v2442_v11 = vmax.f32 %v1440_v2, 0.0  ;;  %v4696_v54 = vld [vmem:[%s5061_s23 + $0x200] sm:$0xff]  }
 0x10f   : > { %v2694_v1 = vadd.f32 %v2693_v63, %v2439_v62  ;;  %v2440_v3 = vmax.f32 %v1432_v0, 0.0  ;;  %4408 = vmatprep.mubr.bf16.mxu0 %v4684_v59 }
 0x111   : > { %v2695_v6 = vadd.f32 %v2694_v1, %v2440_v3  ;;  %v4302_v7 = vpop.f32.mrb[8].mxu0  ;;  %v4697_v3 = vld [vmem:[%s5061_s23 + $0x208] sm:$0xff]  }
 0x112   : > { %v1444_v9 = vpop.f32.mrb[9].mxu0  ;;  %v1453_v17 = vadd.f32 %v4302_v7, %v5170_v33 }
 0x113   : > { %v2696_v12 = vadd.f32 %v2695_v6, %v2441_v5  ;;  %v1445_v13 = vadd.f32 %v5170_v33, %v1444_v9  ;;  %v4303_v14 = vpop.f32.mrb[10].mxu0 }
 0x114   : > { %v1447_v16 = vpop.f32.mrb[11].mxu0  ;;  %v1456_v22 = vadd.f32 %v4303_v14, %v5170_v33  ;;  %v2445_v25 = vmax.f32 %v1453_v17, 0.0 }
 0x115   : > { %v2443_v18 = vmax.f32 %v1445_v13, 0.0  ;;  %v2697_v19 = vadd.f32 %v2696_v12, %v2442_v11  ;;  %v1448_v20 = vadd.f32 %v5170_v33, %v1447_v16 }
 0x116   : > { %4409 = vmatmul.mubr.bf16.gmra.mrb[116].mxu0 %v4685_v10  ;;  %v2446_v31 = vmax.f32 %v1456_v22, 0.0 }
 0x117   : > { %v2698_v21 = vadd.f32 %v2697_v19, %v2443_v18  ;;  %v2444_v23 = vmax.f32 %v1448_v20, 0.0  ;;  %4412 = vmatprep.mubr.bf16.mxu0 %v4688_v15 }
 0x119   : > { %v2699_v26 = vadd.f32 %v2698_v21, %v2444_v23  ;;  %v4306_v27 = vpop.f32.mrb[12].mxu0  ;;  %v4701_v21 = vld [vmem:[%s5061_s23 + $0x218] sm:$0xff]  }
 0x11a   : > { %v1460_v29 = vpop.f32.mrb[13].mxu0  ;;  %v1469_v38 = vadd.f32 %v4306_v27, %v5170_v33 }
 0x11b   : > { %v2700_v32 = vadd.f32 %v2699_v26, %v2445_v25  ;;  %v1461_v34 = vadd.f32 %v5170_v33, %v1460_v29  ;;  %v4307_v35 = vpop.f32.mrb[14].mxu0  ;;  %v4704_v26 = vld [vmem:[%s5061_s23 + $0x220] sm:$0xff]  }
 0x11c   : > { %v1463_v37 = vpop.f32.mrb[15].mxu0  ;;  %v1472_v43 = vadd.f32 %v4307_v35, %v5170_v33  ;;  %v2449_v45 = vmax.f32 %v1469_v38, 0.0 }
 0x11d   : > { %v2447_v39 = vmax.f32 %v1461_v34, 0.0  ;;  %v2701_v40 = vadd.f32 %v2700_v32, %v2446_v31  ;;  %v1464_v41 = vadd.f32 %v5170_v33, %v1463_v37 }
 0x11e   : > { %4413 = vmatmul.mubr.bf16.gmra.mrb[120].mxu0 %v4689_v30  ;;  %v2450_v50 = vmax.f32 %v1472_v43, 0.0 }
 0x11f   : > { %v2702_v42 = vadd.f32 %v2701_v40, %v2447_v39  ;;  %v2448_v44 = vmax.f32 %v1464_v41, 0.0  ;;  %4416 = vmatprep.mubr.bf16.mxu0 %v4692_v36  ;;  %v4705_v40 = vld [vmem:[%s5061_s23 + $0x228] sm:$0xff]  }
 0x121   : > { %v2703_v46 = vadd.f32 %v2702_v42, %v2448_v44  ;;  %v4310_v47 = vpop.f32.mrb[16].mxu0 }
 0x122   : > { %v1476_v48 = vpop.f32.mrb[17].mxu0  ;;  %v1485_v56 = vadd.f32 %v4310_v47, %v5170_v33 }
 0x123   : > { %v2704_v51 = vadd.f32 %v2703_v46, %v2449_v45  ;;  %v1477_v52 = vadd.f32 %v5170_v33, %v1476_v48  ;;  %v4311_v53 = vpop.f32.mrb[18].mxu0  ;;  %v4708_v45 = vld [vmem:[%s5061_s23 + $0x230] sm:$0xff]  }
 0x124   : > { %v1479_v55 = vpop.f32.mrb[19].mxu0  ;;  %v1488_v61 = vadd.f32 %v4311_v53, %v5170_v33  ;;  %v2453_v63 = vmax.f32 %v1485_v56, 0.0 }
 0x125   : > { %v2451_v57 = vmax.f32 %v1477_v52, 0.0  ;;  %v2705_v58 = vadd.f32 %v2704_v51, %v2450_v50  ;;  %v1480_v59 = vadd.f32 %v5170_v33, %v1479_v55 }
 0x126   : > { %4417 = vmatmul.mubr.bf16.gmra.mrb[124].mxu0 %v4693_v49  ;;  %v2454_v4 = vmax.f32 %v1488_v61, 0.0 }
 0x127   : > { %v2706_v60 = vadd.f32 %v2705_v58, %v2451_v57  ;;  %v2452_v62 = vmax.f32 %v1480_v59, 0.0  ;;  %4420 = vmatprep.mubr.bf16.mxu0 %v4696_v54  ;;  %v4709_v58 = vld [vmem:[%s5061_s23 + $0x238] sm:$0xff]  }
 0x129   : > { %v2707_v0 = vadd.f32 %v2706_v60, %v2452_v62  ;;  %v4314_v1 = vpop.f32.mrb[20].mxu0 }
 0x12a   : > { %v1492_v2 = vpop.f32.mrb[21].mxu0  ;;  %v1501_v10 = vadd.f32 %v4314_v1, %v5170_v33 }
 0x12b   : > { %v2708_v5 = vadd.f32 %v2707_v0, %v2453_v63  ;;  %v1493_v6 = vadd.f32 %v5170_v33, %v1492_v2  ;;  %v4315_v7 = vpop.f32.mrb[22].mxu0  ;;  %v4712_v63 = vld [vmem:[%s5061_s23 + $0x240] sm:$0xff]  }
 0x12c   : > { %v1495_v9 = vpop.f32.mrb[23].mxu0  ;;  %v1504_v15 = vadd.f32 %v4315_v7, %v5170_v33  ;;  %v2457_v17 = vmax.f32 %v1501_v10, 0.0 }
 0x12d   : > { %v2455_v11 = vmax.f32 %v1493_v6, 0.0  ;;  %v2709_v12 = vadd.f32 %v2708_v5, %v2454_v4  ;;  %v1496_v13 = vadd.f32 %v5170_v33, %v1495_v9 }
 0x12e   : > { %4421 = vmatmul.mubr.bf16.gmra.mrb[128].mxu0 %v4697_v3  ;;  %v2458_v22 = vmax.f32 %v1504_v15, 0.0 }
 0x12f   : > { %v2710_v14 = vadd.f32 %v2709_v12, %v2455_v11  ;;  %v2456_v16 = vmax.f32 %v1496_v13, 0.0  ;;  %4424 = vmatprep.mubr.bf16.mxu0 %v4700_v8  ;;  %v4713_v11 = vld [vmem:[%s5061_s23 + $0x248] sm:$0xff]  }
 0x131   : > { %v2711_v18 = vadd.f32 %v2710_v14, %v2456_v16  ;;  %v4318_v19 = vpop.f32.mrb[24].mxu0  ;;  %v4716_v16 = vld [vmem:[%s5061_s23 + $0x250] sm:$0xff]  }
 0x132   : > { %v1508_v20 = vpop.f32.mrb[25].mxu0  ;;  %v1517_v28 = vadd.f32 %v4318_v19, %v5170_v33 }
 0x133   : > { %v2712_v23 = vadd.f32 %v2711_v18, %v2457_v17  ;;  %v1509_v24 = vadd.f32 %v5170_v33, %v1508_v20  ;;  %v4319_v25 = vpop.f32.mrb[26].mxu0 }
 0x134   : > { %v1511_v27 = vpop.f32.mrb[27].mxu0  ;;  %v1520_v34 = vadd.f32 %v4319_v25, %v5170_v33  ;;  %v2461_v36 = vmax.f32 %v1517_v28, 0.0 }
 0x135   : > { %v2459_v29 = vmax.f32 %v1509_v24, 0.0  ;;  %v2713_v30 = vadd.f32 %v2712_v23, %v2458_v22  ;;  %v1512_v31 = vadd.f32 %v5170_v33, %v1511_v27 }
 0x136   : > { %4425 = vmatmul.mubr.bf16.gmra.mrb[132].mxu0 %v4701_v21  ;;  %v2462_v41 = vmax.f32 %v1520_v34, 0.0 }
 0x137   : > { %v2714_v32 = vadd.f32 %v2713_v30, %v2459_v29  ;;  %v2460_v35 = vmax.f32 %v1512_v31, 0.0  ;;  %4428 = vmatprep.mubr.bf16.mxu0 %v4704_v26  ;;  %v4717_v29 = vld [vmem:[%s5061_s23 + $0x258] sm:$0xff]  }
 0x139   : > { %v2715_v37 = vadd.f32 %v2714_v32, %v2460_v35  ;;  %v4322_v38 = vpop.f32.mrb[28].mxu0  ;;  %v4720_v35 = vld [vmem:[%s5061_s23 + $0x260] sm:$0xff]  }
 0x13a   : > { %v1524_v39 = vpop.f32.mrb[29].mxu0  ;;  %v1533_v47 = vadd.f32 %v4322_v38, %v5170_v33 }
 0x13b   : > { %v2716_v42 = vadd.f32 %v2715_v37, %v2461_v36  ;;  %v1525_v43 = vadd.f32 %v5170_v33, %v1524_v39  ;;  %v4323_v44 = vpop.f32.mrb[30].mxu0 }
 0x13c   : > { %v1527_v46 = vpop.f32.mrb[31].mxu0  ;;  %v1536_v52 = vadd.f32 %v4323_v44, %v5170_v33  ;;  %v2465_v54 = vmax.f32 %v1533_v47, 0.0  ;;  %v5248_v44 = vpop.f32.mrb[0].mxu1 }
 0x13d   : > { %v2463_v48 = vmax.f32 %v1525_v43, 0.0  ;;  %v2717_v49 = vadd.f32 %v2716_v42, %v2462_v41  ;;  %v1528_v50 = vadd.f32 %v5170_v33, %v1527_v46 }
 0x13e   : > { %4429 = vmatmul.mubr.bf16.gmra.mrb[136].mxu0 %v4705_v40  ;;  %v2466_v59 = vmax.f32 %v1536_v52, 0.0 }
 0x13f   : > { %v2718_v51 = vadd.f32 %v2717_v49, %v2463_v48  ;;  %v2464_v53 = vmax.f32 %v1528_v50, 0.0  ;;  %4432 = vmatprep.mubr.bf16.mxu0 %v4708_v45  ;;  %v5250_v48 = vpop.f32.mrb[1].mxu1  ;;  %v4721_v50 = vld [vmem:[%s5061_s23 + $0x268] sm:$0xff]  }
 0x141   : > { %v2719_v55 = vadd.f32 %v2718_v51, %v2464_v53  ;;  %v4326_v56 = vpop.f32.mrb[32].mxu0  ;;  %v5253_v51 = vpop.f32.mrb[2].mxu1 }
 0x142   : > { %v1540_v57 = vpop.f32.mrb[33].mxu0  ;;  %v1549_v2 = vadd.f32 %v4326_v56, %v5170_v33  ;;  %v4724_v56 = vld [vmem:[%s5061_s23 + $0x270] sm:$0xff]  }
 0x143   : > { %v2720_v60 = vadd.f32 %v2719_v55, %v2465_v54  ;;  %v1541_v61 = vadd.f32 %v5170_v33, %v1540_v57  ;;  %v4327_v62 = vpop.f32.mrb[34].mxu0  ;;  %v5257_v57 = vpop.f32.mrb[3].mxu1 }
 0x144   : > { %v1543_v0 = vpop.f32.mrb[35].mxu0  ;;  %v1552_v5 = vadd.f32 %v4327_v62, %v5170_v33  ;;  %v2469_v7 = vmax.f32 %v1549_v2, 0.0 }
 0x145   : > { %v5231_v1 = vadd.f32 %v2720_v60, %v2466_v59  ;;  %v1544_v3 = vadd.f32 %v5170_v33, %v1543_v0  ;;  %v2467_v4 = vmax.f32 %v1541_v61, 0.0 }
 0x146   : > { %4433 = vmatmul.mubr.bf16.gmra.mrb[140].mxu0 %v4709_v58  ;;  %v2470_v12 = vmax.f32 %v1552_v5, 0.0 }
 0x147   : > { %v2468_v6 = vmax.f32 %v1544_v3, 0.0  ;;  %4436 = vmatprep.mubr.bf16.mxu0 %v4712_v63  ;;  %v5262_v3 = vpop.f32.mrb[4].mxu1 }
 0x149   : > { %v2728_v8 = vadd.f32 %v2468_v6, %v2467_v4  ;;  %v4330_v9 = vpop.f32.mrb[36].mxu0 }
 0x14a   : > { %v1556_v10 = vpop.f32.mrb[37].mxu0  ;;  %v1565_v18 = vadd.f32 %v4330_v9, %v5170_v33  ;;  %v4725_v9 = vld [vmem:[%s5061_s23 + $0x278] sm:$0xff]  }
 0x14b   : > { %v2729_v13 = vadd.f32 %v2728_v8, %v2469_v7  ;;  %v1557_v14 = vadd.f32 %v5170_v33, %v1556_v10  ;;  %v4331_v15 = vpop.f32.mrb[38].mxu0  ;;  %v5264_v7 = vpop.f32.mrb[5].mxu1 }
 0x14c   : > { %v1559_v17 = vpop.f32.mrb[39].mxu0  ;;  %v1568_v23 = vadd.f32 %v4331_v15, %v5170_v33  ;;  %v2473_v25 = vmax.f32 %v1565_v18, 0.0  ;;  %v5267_v10 = vpop.f32.mrb[6].mxu1  ;;  %v4728_v15 = vld [vmem:[%s5061_s23 + $0x280] sm:$0xff]  }
 0x14d   : > { %v2471_v19 = vmax.f32 %v1557_v14, 0.0  ;;  %v2730_v20 = vadd.f32 %v2729_v13, %v2470_v12  ;;  %v1560_v21 = vadd.f32 %v5170_v33, %v1559_v17 }
 0x14e   : > { %4437 = vmatmul.mubr.bf16.gmra.mrb[144].mxu0 %v4713_v11  ;;  %v2474_v30 = vmax.f32 %v1568_v23, 0.0 }
 0x14f   : > { %v2731_v22 = vadd.f32 %v2730_v20, %v2471_v19  ;;  %v2472_v24 = vmax.f32 %v1560_v21, 0.0  ;;  %4440 = vmatprep.mubr.bf16.mxu0 %v4716_v16  ;;  %v5271_v16 = vpop.f32.mrb[7].mxu1 }
 0x151   : > { %v2732_v26 = vadd.f32 %v2731_v22, %v2472_v24  ;;  %v4334_v27 = vpop.f32.mrb[40].mxu0 }
 0x152   : > { %v1572_v28 = vpop.f32.mrb[41].mxu0  ;;  %v1581_v37 = vadd.f32 %v4334_v27, %v5170_v33 }
 0x153   : > { %v2733_v31 = vadd.f32 %v2732_v26, %v2473_v25  ;;  %v1573_v32 = vadd.f32 %v5170_v33, %v1572_v28  ;;  %v4335_v34 = vpop.f32.mrb[42].mxu0  ;;  %v5276_v25 = vpop.f32.mrb[8].mxu1 }
 0x154   : > { %v1575_v36 = vpop.f32.mrb[43].mxu0  ;;  %v1584_v42 = vadd.f32 %v4335_v34, %v5170_v33  ;;  %v2477_v45 = vmax.f32 %v1581_v37, 0.0 }
 0x155   : > { %v2475_v38 = vmax.f32 %v1573_v32, 0.0  ;;  %v2734_v39 = vadd.f32 %v2733_v31, %v2474_v30  ;;  %v1576_v40 = vadd.f32 %v5170_v33, %v1575_v36  ;;  %v4729_v31 = vld [vmem:[%s5061_s23 + $0x288] sm:$0xff]  }
 0x156   : > { %4441 = vmatmul.mubr.bf16.gmra.mrb[148].mxu0 %v4717_v29  ;;  %v2478_v52 = vmax.f32 %v1584_v42, 0.0  ;;  %v5278_v29 = vpop.f32.mrb[9].mxu1 }
 0x157   : > { %v2735_v41 = vadd.f32 %v2734_v39, %v2475_v38  ;;  %v2476_v43 = vmax.f32 %v1576_v40, 0.0  ;;  %4444 = vmatprep.mubr.bf16.mxu0 %v4720_v35  ;;  %v5281_v32 = vpop.f32.mrb[10].mxu1  ;;  %v4732_v38 = vld [vmem:[%s5061_s23 + $0x290] sm:$0xff]  }
 0x158   : > { %v5285_v39 = vpop.f32.mrb[11].mxu1 }
 0x159   : > { %v2736_v46 = vadd.f32 %v2735_v41, %v2476_v43  ;;  %v4338_v47 = vpop.f32.mrb[44].mxu0 }
 0x15a   : > { %v1588_v49 = vpop.f32.mrb[45].mxu0  ;;  %v1597_v59 = vadd.f32 %v4338_v47, %v5170_v33 }
 0x15b   : > { %v2737_v53 = vadd.f32 %v2736_v46, %v2477_v45  ;;  %v1589_v54 = vadd.f32 %v5170_v33, %v1588_v49  ;;  %v4339_v55 = vpop.f32.mrb[46].mxu0  ;;  %v5289_v46 = vpop.f32.mrb[12].mxu1 }
 0x15c   : > { %v1591_v58 = vpop.f32.mrb[47].mxu0  ;;  %v1600_v0 = vadd.f32 %v4339_v55, %v5170_v33  ;;  %v2481_v4 = vmax.f32 %v1597_v59, 0.0 }
 0x15d   : > { %v2479_v60 = vmax.f32 %v1589_v54, 0.0  ;;  %v2738_v61 = vadd.f32 %v2737_v53, %v2478_v52  ;;  %v1592_v62 = vadd.f32 %v5170_v33, %v1591_v58  ;;  %v5292_v52 = vpop.f32.mrb[13].mxu1 }
 0x15e   : > { %4445 = vmatmul.mubr.bf16.gmra.mrb[152].mxu0 %v4721_v50  ;;  %v2482_v11 = vmax.f32 %v1600_v0, 0.0  ;;  %v5294_v53 = vpop.f32.mrb[14].mxu1 }
 0x15f   : > { %v2739_v63 = vadd.f32 %v2738_v61, %v2479_v60  ;;  %v2480_v2 = vmax.f32 %v1592_v62, 0.0  ;;  %4448 = vmatprep.mubr.bf16.mxu0 %v4724_v56  ;;  %v5296_v58 = vpop.f32.mrb[15].mxu1  ;;  %v4733_v60 = vld [vmem:[%s5061_s23 + $0x298] sm:$0xff]  }
 0x160   : > { %v5299_v61 = vpop.f32.mrb[16].mxu1 }
 0x161   : > { %v2740_v5 = vadd.f32 %v2739_v63, %v2480_v2  ;;  %v4342_v6 = vpop.f32.mrb[48].mxu0 }
 0x162   : > { %v1604_v8 = vpop.f32.mrb[49].mxu0  ;;  %v1613_v18 = vadd.f32 %v4342_v6, %v5170_v33  ;;  %v2722_v6 = vrot.slane %v5231_v1, 4 }
 0x163   : > { %v2741_v12 = vadd.f32 %v2740_v5, %v2481_v4  ;;  %v1605_v13 = vadd.f32 %v5170_v33, %v1604_v8  ;;  %v4343_v14 = vpop.f32.mrb[50].mxu0  ;;  %v4736_v4 = vld [vmem:[%s5061_s23 + $0x2a0] sm:$0xff]   ;;  %v5303_v5 = vpop.f32.mrb[17].mxu1 }
 0x164   : > { %v1607_v17 = vpop.f32.mrb[51].mxu0  ;;  %v1616_v23 = vadd.f32 %v4343_v14, %v5170_v33  ;;  %v2485_v26 = vmax.f32 %v1613_v18, 0.0 }
 0x165   : > { %v2483_v19 = vmax.f32 %v1605_v13, 0.0  ;;  %v2742_v20 = vadd.f32 %v2741_v12, %v2482_v11  ;;  %v1608_v21 = vadd.f32 %v5170_v33, %v1607_v17 }
 0x166   : > { %4449 = vmatmul.mubr.bf16.gmra.mrb[156].mxu0 %v4725_v9  ;;  %v2486_v34 = vmax.f32 %v1616_v23, 0.0  ;;  %v5306_v9 = vpop.f32.mrb[18].mxu1 }
 0x167   : > { %v2743_v22 = vadd.f32 %v2742_v20, %v2483_v19  ;;  %v2484_v24 = vmax.f32 %v1608_v21, 0.0  ;;  %4452 = vmatprep.mubr.bf16.mxu0 %v4728_v15  ;;  %v5310_v15 = vpop.f32.mrb[19].mxu1  ;;  %v4746_v21 = vld [vmem:[%s5929_s3] ss:$16 sps:$4 sm:$0xff]  }
 0x168   : > { %v4486_v17 = vpop.f32.mrb[20].mxu1 }
 0x169   : > { %v2744_v27 = vadd.f32 %v2743_v22, %v2484_v24  ;;  %v4346_v28 = vpop.f32.mrb[52].mxu0  ;;  %v4748_v22 = vld [vmem:[%s5929_s3 + $0x4] ss:$16 sps:$4 sm:$0xff]   ;;  %v2180_v23 = vpop.f32.mrb[21].mxu1  ;;  %v2723_v24 = vadd.f32 %v2722_v6, %v5231_v1 }
 0x16a   : > { %v1620_v30 = vpop.f32.mrb[53].mxu0  ;;  %v1629_v41 = vadd.f32 %v4346_v28, %v5170_v33  ;;  %3241 = vmatprep.subr.bf16.mxu1 %v4748_v22 }
 0x16b   : > { %v2745_v35 = vadd.f32 %v2744_v27, %v2485_v26  ;;  %v1621_v36 = vadd.f32 %v5170_v33, %v1620_v30  ;;  %v4347_v37 = vpop.f32.mrb[54].mxu0  ;;  %v4487_v26 = vpop.f32.mrb[22].mxu1  ;;  %3242 = vmatpush1.bf16.msra.mxu1 %v4746_v21 }
 0x16c   : > { %v1623_v40 = vpop.f32.mrb[55].mxu0  ;;  %v1632_v49 = vadd.f32 %v4347_v37, %v5170_v33  ;;  %v2489_v54 = vmax.f32 %v1629_v41, 0.0 }
 0x16d   : > { %v2487_v42 = vmax.f32 %v1621_v36, 0.0  ;;  %v2746_v43 = vadd.f32 %v2745_v35, %v2486_v34  ;;  %v1624_v45 = vadd.f32 %v5170_v33, %v1623_v40  ;;  %v4737_v35 = vld [vmem:[%s5061_s23 + $0x2a8] sm:$0xff]   ;;  %v2181_v36 = vadd.f32 %v5170_v33, %v2180_v23  ;;  %s272_s23 = sand.u32 1, %s4948_s25  }
 0x16e   : > { %4453 = vmatmul.mubr.bf16.gmra.mrb[160].mxu0 %v4729_v31  ;;  %v2490_v62 = vmax.f32 %v1632_v49, 0.0  ;;  %v2183_v31 = vpop.f32.mrb[23].mxu1  ;;  %s3896_s13 = sshll.u32 %s272_s23, 4  ;;  %s3819_s20 = scalar_lea.sflag [#allocation3], %s272_s23 }
 0x16f   : > { %v2747_v47 = vadd.f32 %v2746_v43, %v2487_v42  ;;  %v2488_v50 = vmax.f32 %v1624_v45, 0.0  ;;  %4456 = vmatprep.mubr.bf16.mxu0 %v4732_v38  ;;  %v2184_v42 = vadd.f32 %v5170_v33, %v2183_v31  ;;  %v2724_v43 = vrot.slane %v2723_v24, 2  ;;  %s274_s15 = scalar_lea.vmem [#allocation2], %s3896_s13 }
 0x170   : > { %s3833_s16 = sshll.u32 %s274_s15, 4  ;;  %s5886_s16 = int_to_ptr.vmem [resolvable:$true] %s3833_s16 }
 0x171   : > { %v2748_v55 = vadd.f32 %v2747_v47, %v2488_v50  ;;  %v4350_v56 = vpop.f32.mrb[56].mxu0  ;;  %v2189_v47 = vadd.f32 %v4486_v17, %v5170_v33  ;;  %v2725_v6 = vadd.f32 %v2724_v43, %v2723_v24  ;;  %s4894_s28 = scalar_lea.vmem %s5886_s16, 256  ;;  %p4901_p0 = scmp.lt.s32.totalorder %s5886_s16, %s4899_s22 }
 0x172   : > { %v1636_v59 = vpop.f32.mrb[57].mxu0  ;;  %v1645_v11 = vadd.f32 %v4350_v56, %v5170_v33  ;;  %p4895_p11 = scmp.ne.s32.totalorder %s5886_s16, %s4894_s28  ;;  %p4902_p1 = scmp.lt.s32.totalorder %s4900_s29, %s4894_s28 }
 0x173   : > { %v2749_v63 = vadd.f32 %v2748_v55, %v2489_v54  ;;  %v1637_v0 = vadd.f32 %v5170_v33, %v1636_v59  ;;  %v4351_v2 = vpop.f32.mrb[58].mxu0  ;;  %v2627_v55 = vmax.f32 %v2181_v36, 0.0  ;;  %v2192_v59 = vadd.f32 %v4487_v26, %v5170_v33 }
 0x174   : > { %v1639_v8 = vpop.f32.mrb[59].mxu0  ;;  %v1648_v19 = vadd.f32 %v4351_v2, %v5170_v33  ;;  %v2493_v27 = vmax.f32 %v1645_v11, 0.0  ;;  %v2628_v2 = vmax.f32 %v2184_v42, 0.0  ;;  %v2726_v24 = vrot.slane %v2725_v6, 1  ;;  %p4896_p12 = pnand %p4895_p11, %p5038_p5  ;;  %p4903_p2 = por %p4902_p1, %p4901_p0 }
 0x175   : > { %v2491_v12 = vmax.f32 %v1637_v0, 0.0  ;;  %v2750_v13 = vadd.f32 %v2749_v63, %v2490_v62  ;;  %v1640_v14 = vadd.f32 %v5170_v33, %v1639_v8  ;;  %v2629_v0 = vmax.f32 %v2189_v47, 0.0 }
 0x176   : > { %4457 = vmatmul.mubr.bf16.gmra.mrb[164].mxu0 %v4733_v60  ;;  %v2494_v37 = vmax.f32 %v1648_v19, 0.0  ;;  %v4490_v60 = vpop.f32.mrb[24].mxu1  ;;  %v2630_v17 = vmax.f32 %v2192_v59, 0.0  ;;  %p4897_p13 = pneg %p4896_p12 }
 0x177   : > { %v2751_v18 = vadd.f32 %v2750_v13, %v2491_v12  ;;  %v2492_v20 = vmax.f32 %v1640_v14, 0.0  ;;  %4460 = vmatprep.mubr.bf16.mxu0 %v4736_v4  ;;  %v2196_v4 = vpop.f32.mrb[25].mxu1 }
 0x178   : > { %v2197_v8 = vadd.f32 %v5170_v33, %v2196_v4  ;;  %v4491_v11 = vpop.f32.mrb[26].mxu1  ;;  %p4904_p3 = pnand %p4903_p2, %p4897_p13 }
 0x179   : > { %v2752_v28 = vadd.f32 %v2751_v18, %v2492_v20  ;;  %v4354_v30 = vpop.f32.mrb[60].mxu0  ;;  %v2913_v18 = vadd.f32 %v2628_v2, %v2627_v55  ;;  %v2199_v19 = vpop.f32.mrb[27].mxu1  ;;  %v2208_v43 = vadd.f32 %v4491_v11, %v5170_v33  ;;  %v2727_v55 = vadd.f32 %v2726_v24, %v2725_v6 }
 0x17a   : > { %v1652_v34 = vpop.f32.mrb[61].mxu0  ;;  %v1661_v1 = vadd.f32 %v4354_v30, %v5170_v33  ;;  %v2200_v22 = vadd.f32 %v5170_v33, %v2199_v19  ;;  %v2631_v30 = vmax.f32 %v2197_v8, 0.0 }
 0x17b   : > { %v2753_v38 = vadd.f32 %v2752_v28, %v2493_v27  ;;  %v1653_v40 = vadd.f32 %v5170_v33, %v1652_v34  ;;  %v4355_v41 = vpop.f32.mrb[62].mxu0  ;;  %v2914_v28 = vadd.f32 %v2913_v18, %v2629_v0 }
 0x17c   : > { %v1655_v45 = vpop.f32.mrb[63].mxu0  ;;  %v1664_v56 = vadd.f32 %v4355_v41, %v5170_v33  ;;  %v2497_v12 = vmax.f32 %v1661_v1, 0.0  ;;  %v4494_v1 = vpop.f32.mrb[28].mxu1 }
 0x17d   : > { %v2495_v49 = vmax.f32 %v1653_v40, 0.0  ;;  %v2754_v50 = vadd.f32 %v2753_v38, %v2494_v37  ;;  %v1656_v54 = vadd.f32 %v5170_v33, %v1655_v45  ;;  %v2915_v38 = vadd.f32 %v2914_v28, %v2630_v17 }
 0x17e   : > { %4461 = vmatmul.mubr.bf16.gmra.mrb[168].mxu0 %v4737_v35  ;;  %v2498_v20 = vmax.f32 %v1664_v56, 0.0  ;;  %v2205_v35 = vadd.f32 %v4490_v60, %v5170_v33  ;;  %v2632_v40 = vmax.f32 %v2200_v22, 0.0 }
 0x17f   : > { %v2755_v62 = vadd.f32 %v2754_v50, %v2495_v49  ;;  %v2496_v63 = vmax.f32 %v1656_v54, 0.0  ;;  %v2916_v50 = vadd.f32 %v2915_v38, %v2631_v30  ;;  %v2212_v54 = vpop.f32.mrb[29].mxu1 }
 0x180   : > { %v2633_v49 = vmax.f32 %v2205_v35, 0.0  ;;  %v2213_v56 = vadd.f32 %v5170_v33, %v2212_v54  ;;  %v4495_v59 = vpop.f32.mrb[30].mxu1 }
 0x181   : > { %v2756_v13 = vadd.f32 %v2755_v62, %v2496_v63  ;;  %v4358_v14 = vpop.f32.mrb[64].mxu0  ;;  %v2917_v2 = vadd.f32 %v2916_v50, %v2632_v40  ;;  %v2215_v4 = vpop.f32.mrb[31].mxu1  ;;  %v2224_v35 = vadd.f32 %v4495_v59, %v5170_v33 }
 0x182   : > { %v1668_v21 = vpop.f32.mrb[65].mxu0  ;;  %v1677_v31 = vadd.f32 %v4358_v14, %v5170_v33  ;;  %v2216_v11 = vadd.f32 %v5170_v33, %v2215_v4 }
 0x183   : > { %v2757_v23 = vadd.f32 %v2756_v13, %v2497_v12  ;;  %v1669_v26 = vadd.f32 %v5170_v33, %v1668_v21  ;;  %v4359_v27 = vpop.f32.mrb[66].mxu0  ;;  %v2634_v13 = vmax.f32 %v2208_v43, 0.0  ;;  %v2918_v6 = vadd.f32 %v2917_v2, %v2633_v49 }
 0x184   : > { %v1671_v34 = vpop.f32.mrb[67].mxu0  ;;  %v1680_v42 = vadd.f32 %v4359_v27, %v5170_v33  ;;  %v2501_v62 = vmax.f32 %v1677_v31, 0.0 }
 0x185   : > { %v2758_v36 = vadd.f32 %v2757_v23, %v2498_v20  ;;  %v1672_v37 = vadd.f32 %v5170_v33, %v1671_v34  ;;  %v2499_v41 = vmax.f32 %v1669_v26, 0.0  ;;  %v2987_v20 = vpack.c.bf16 %v2727_v55, %v2727_v55 }
 0x186   : > { %v2502_v8 = vmax.f32 %v1680_v42, 0.0  ;;  %v2221_v23 = vadd.f32 %v4494_v1, %v5170_v33  ;;  %v2635_v26 = vmax.f32 %v2213_v56, 0.0  ;;  %v2919_v34 = vadd.f32 %v2918_v6, %v2634_v13 }
 0x187   : > { %v2759_v45 = vrot.slane %v2758_v36, 4  ;;  %v2500_v47 = vmax.f32 %v1672_v37, 0.0  ;;  %v4498_v37 = vpop.f32.mrb[32].mxu1 }
 0x188   : > { %v2228_v42 = vpop.f32.mrb[33].mxu1  ;;  %v2637_v43 = vmax.f32 %v2221_v23, 0.0 }
 0x189   : > { %v2760_v60 = vadd.f32 %v2759_v45, %v2758_v36  ;;  %v2765_v63 = vadd.f32 %v2500_v47, %v2499_v41  ;;  %v4362_v0 = vpop.f32.mrb[68].mxu0  ;;  %v2636_v36 = vmax.f32 %v2216_v11, 0.0  ;;  %v2920_v45 = vadd.f32 %v2919_v34, %v2635_v26  ;;  %v4499_v47 = vpop.f32.mrb[34].mxu1  ;;  %v4751_v34 = vld [vmem:[%s5929_s3 + $0x24] ss:$16 sps:$4 sm:$0xff]  }
 0x18a   : > { %v1684_v12 = vpop.f32.mrb[69].mxu0  ;;  %v1693_v21 = vadd.f32 %v4362_v0, %v5170_v33  ;;  %v2229_v1 = vadd.f32 %v5170_v33, %v2228_v42  ;;  %v2231_v56 = vpop.f32.mrb[35].mxu1  ;;  %3243 = vmatprep.subr.bf16.mxu1 %v4751_v34 }
 0x18b   : > { %v2761_v14 = vrot.slane %v2760_v60, 2  ;;  %v2766_v17 = vadd.f32 %v2765_v63, %v2501_v62  ;;  %v1685_v18 = vadd.f32 %v5170_v33, %v1684_v12  ;;  %v4363_v19 = vpop.f32.mrb[70].mxu0  ;;  %v2638_v63 = vmax.f32 %v2224_v35, 0.0 }
 0x18c   : > { %v1687_v22 = vpop.f32.mrb[71].mxu0  ;;  %v1696_v31 = vadd.f32 %v4363_v19, %v5170_v33  ;;  %v2505_v50 = vmax.f32 %v1693_v21, 0.0  ;;  %v2921_v0 = vadd.f32 %v2920_v45, %v2636_v36  ;;  %v2232_v19 = vadd.f32 %v5170_v33, %v2231_v56 }
 0x18d   : > { %v2762_v27 = vadd.f32 %v2761_v14, %v2760_v60  ;;  %v2503_v28 = vmax.f32 %v1685_v18, 0.0  ;;  %v2767_v30 = vadd.f32 %v2766_v17, %v2502_v8  ;;  %v1688_v24 = vadd.f32 %v5170_v33, %v1687_v22 }
 0x18e   : > { %v3057_v60 = vunpack.c.l.b16 %v2987_v20  ;;  %v2506_v62 = vmax.f32 %v1696_v31, 0.0  ;;  %v2922_v14 = vadd.f32 %v2921_v0, %v2637_v43  ;;  %v2237_v17 = vadd.f32 %v4498_v37, %v5170_v33  ;;  %v4749_v31 = vld [vmem:[%s5929_s3 + $0x20] ss:$16 sps:$4 sm:$0xff]  }
 0x18f   : > { %v2763_v38 = vrot.slane %v2762_v27, 1  ;;  %v2768_v40 = vadd.f32 %v2767_v30, %v2503_v28  ;;  %v2504_v41 = vmax.f32 %v1688_v24, 0.0  ;;  %v2639_v18 = vmax.f32 %v2229_v1, 0.0  ;;  %3244 = vmatpush1.bf16.msra.mxu1 %v4749_v31 }
 0x190   : > { %v2923_v26 = vadd.f32 %v2922_v14, %v2638_v63  ;;  %v2240_v35 = vadd.f32 %v4499_v47, %v5170_v33  ;;  %v2641_v37 = vmax.f32 %v2237_v17, 0.0 }
 0x191   : > { %v2764_v49 = vadd.f32 %v2763_v38, %v2762_v27  ;;  %v2769_v54 = vadd.f32 %v2768_v40, %v2504_v41  ;;  %v4366_v55 = vpop.f32.mrb[72].mxu0  ;;  %v4502_v27 = vpop.f32.mrb[36].mxu1  ;;  %v2640_v40 = vmax.f32 %v2232_v19, 0.0 }
 0x192   : > { %v1700_v59 = vpop.f32.mrb[73].mxu0  ;;  %v1709_v8 = vadd.f32 %v4366_v55, %v5170_v33  ;;  %v2244_v36 = vpop.f32.mrb[37].mxu1  ;;  %v2924_v38 = vadd.f32 %v2923_v26, %v2639_v18 }
 0x193   : > { %v2988_v2 = vpack.c.bf16 %v2764_v49, %v2764_v49  ;;  %v2770_v4 = vadd.f32 %v2769_v54, %v2505_v50  ;;  %v1701_v12 = vadd.f32 %v5170_v33, %v1700_v59  ;;  %v4367_v13 = vpop.f32.mrb[74].mxu0  ;;  %v2245_v41 = vadd.f32 %v5170_v33, %v2244_v36  ;;  %v4503_v42 = vpop.f32.mrb[38].mxu1 }
 0x194   : > { %v1703_v11 = vpop.f32.mrb[75].mxu0  ;;  %v1712_v23 = vadd.f32 %v4367_v13, %v5170_v33  ;;  %v2509_v43 = vmax.f32 %v1709_v8, 0.0  ;;  %v2247_v49 = vpop.f32.mrb[39].mxu1  ;;  %v2642_v54 = vmax.f32 %v2240_v35, 0.0  ;;  %v2925_v55 = vadd.f32 %v2924_v38, %v2640_v40 }
 0x195   : > { %v3058_v6 = vunpack.c.l.b16 %v2988_v2  ;;  %v2507_v20 = vmax.f32 %v1701_v12, 0.0  ;;  %v2771_v21 = vadd.f32 %v2770_v4, %v2506_v62  ;;  %v1704_v22 = vadd.f32 %v5170_v33, %v1703_v11  ;;  %v4506_v19 = vpop.f32.mrb[40].mxu1 }
 0x196   : > { %v2248_v56 = vadd.f32 %v5170_v33, %v2247_v49  ;;  %v2926_v0 = vadd.f32 %v2925_v55, %v2641_v37  ;;  %v2253_v2 = vadd.f32 %v4502_v27, %v5170_v33  ;;  %v2643_v4 = vmax.f32 %v2245_v41, 0.0  ;;  %v5373_v27 = vld [vmem:[%s5928_s2] ss:$0 sm:$0xff]  ;;  %v4754_v49 = vld [vmem:[%s5929_s3 + $0x44] ss:$16 sps:$4 sm:$0xff]  }
 0x197   : > { %v5353_v28 = vsel %vm3065_vm0, %v3058_v6, %v3057_v60  ;;  %v2772_v30 = vadd.f32 %v2771_v21, %v2507_v20  ;;  %v2508_v24 = vmax.f32 %v1704_v22, 0.0  ;;  %v2510_v60 = vmax.f32 %v1712_v23, 0.0  ;;  %v2260_v22 = vpop.f32.mrb[41].mxu1  ;;  %3245 = vmatprep.subr.bf16.mxu1 %v4754_v49 }
 0x198   : > { %v2927_v14 = vadd.f32 %v2926_v0, %v2642_v54  ;;  %v2256_v17 = vadd.f32 %v4503_v42, %v5170_v33  ;;  %v2644_v18 = vmax.f32 %v2248_v56, 0.0  ;;  %v2645_v23 = vmax.f32 %v2253_v2, 0.0 }
 0x199   : > { %v2773_v45 = vadd.f32 %v2772_v30, %v2508_v24  ;;  %v4370_v1 = vpop.f32.mrb[76].mxu0  ;;  %v2261_v30 = vadd.f32 %v5373_v27, %v2260_v22  ;;  %v4507_v24 = vpop.f32.mrb[42].mxu1  ;;  %v2269_v55 = vadd.f32 %v5373_v27, %v4506_v19 }
 0x19a   : > { %v1716_v50 = vpop.f32.mrb[77].mxu0  ;;  %v1725_v8 = vadd.f32 %v4370_v1, %v5170_v33  ;;  %v2928_v26 = vadd.f32 %v2927_v14, %v2643_v4  ;;  %v2263_v36 = vpop.f32.mrb[43].mxu1  ;;  %v2646_v38 = vmax.f32 %v2256_v17, 0.0  ;;  %v4752_v1 = vld [vmem:[%s5929_s3 + $0x40] ss:$16 sps:$4 sm:$0xff]   ;;  %v2272_v0 = vadd.f32 %v5373_v27, %v4507_v24 }
 0x19b   : > { %v2774_v47 = vadd.f32 %v2773_v45, %v2509_v43  ;;  %v1717_v62 = vadd.f32 %v5170_v33, %v1716_v50  ;;  %v4371_v59 = vpop.f32.mrb[78].mxu0  ;;  %v2647_v56 = vmax.f32 %v2261_v30, 0.0  ;;  %3246 = vmatpush1.bf16.msra.mxu1 %v4752_v1  ;;  %v4510_v4 = vpop.f32.mrb[44].mxu1  ;;  %v2649_v14 = vmax.f32 %v2269_v55, 0.0 }
 0x19c   : > { %v1719_v63 = vpop.f32.mrb[79].mxu0  ;;  %v1728_v20 = vadd.f32 %v4371_v59, %v5170_v33  ;;  %v2513_v31 = vmax.f32 %v1725_v8, 0.0  ;;  %v2929_v40 = vadd.f32 %v2928_v26, %v2644_v18  ;;  %v2650_v26 = vmax.f32 %v2272_v0, 0.0 }
 0x19d   : > { %v2511_v12 = vmax.f32 %v1717_v62, 0.0  ;;  %v2775_v13 = vadd.f32 %v2774_v47, %v2510_v60  ;;  %v1720_v11 = vadd.f32 %v5170_v33, %v1719_v63  ;;  %v2264_v33 = vadd.f32 %v5373_v27, %v2263_v36 }
 0x19e   : > { %v2514_v41 = vmax.f32 %v1728_v20, 0.0  ;;  %v2930_v54 = vadd.f32 %v2929_v40, %v2645_v23  ;;  %v2285_v40 = vadd.f32 %v5373_v27, %v4510_v4 }
 0x19f   : > { %v2776_v6 = vadd.f32 %v2775_v13, %v2511_v12  ;;  %v2512_v21 = vmax.f32 %v1720_v11, 0.0  ;;  %v2648_v2 = vmax.f32 %v2264_v33, 0.0  ;;  %v2276_v11 = vpop.f32.mrb[45].mxu1 }
 0x1a0   : > { %v2931_v63 = vadd.f32 %v2930_v54, %v2646_v38  ;;  %v2277_v18 = vadd.f32 %v5373_v27, %v2276_v11  ;;  %v4511_v19 = vpop.f32.mrb[46].mxu1 }
 0x1a1   : > { %v2777_v34 = vadd.f32 %v2776_v6, %v2512_v21  ;;  %v4374_v35 = vpop.f32.mrb[80].mxu0  ;;  %v2279_v22 = vpop.f32.mrb[47].mxu1  ;;  %v2288_v49 = vadd.f32 %v5373_v27, %v4511_v19 }
 0x1a2   : > { %v1732_v37 = vpop.f32.mrb[81].mxu0  ;;  %v1741_v60 = vadd.f32 %v5373_v27, %v4374_v35  ;;  %v2932_v17 = vadd.f32 %v2931_v63, %v2647_v56  ;;  %v2280_v24 = vadd.f32 %v5373_v27, %v2279_v22  ;;  %v2651_v33 = vmax.f32 %v2277_v18, 0.0  ;;  %v4514_v54 = vpop.f32.mrb[48].mxu1 }
 0x1a3   : > { %v2778_v42 = vadd.f32 %v2777_v34, %v2513_v31  ;;  %v1733_v43 = vadd.f32 %v5373_v27, %v1732_v37  ;;  %v4375_v45 = vpop.f32.mrb[82].mxu0  ;;  %v2654_v11 = vmax.f32 %v2288_v49, 0.0 }
 0x1a4   : > { %v1735_v50 = vpop.f32.mrb[83].mxu0  ;;  %v1744_v12 = vadd.f32 %v5373_v27, %v4375_v45  ;;  %v2517_v6 = vmax.f32 %v1741_v60, 0.0  ;;  %v2933_v30 = vadd.f32 %v2932_v17, %v2648_v2 }
 0x1a5   : > { %v2515_v47 = vmax.f32 %v1733_v43, 0.0  ;;  %v2779_v62 = vadd.f32 %v2778_v42, %v2514_v41  ;;  %v1736_v59 = vadd.f32 %v5373_v27, %v1735_v50  ;;  %v2652_v50 = vmax.f32 %v2280_v24, 0.0 }
 0x1a6   : > { %v2518_v31 = vmax.f32 %v1744_v12, 0.0  ;;  %v2934_v38 = vadd.f32 %v2933_v30, %v2649_v14 }
 0x1a7   : > { %v2780_v8 = vadd.f32 %v2779_v62, %v2515_v47  ;;  %v2516_v13 = vmax.f32 %v1736_v59, 0.0  ;;  %v2292_v47 = vpop.f32.mrb[49].mxu1  ;;  %v2653_v62 = vmax.f32 %v2285_v40, 0.0 }
 0x1a8   : > { %v2935_v1 = vadd.f32 %v2934_v38, %v2650_v26  ;;  %v2293_v63 = vadd.f32 %v5373_v27, %v2292_v47  ;;  %v4515_v0 = vpop.f32.mrb[50].mxu1 }
 0x1a9   : > { %v2781_v20 = vadd.f32 %v2780_v8, %v2516_v13  ;;  %v4378_v21 = vpop.f32.mrb[84].mxu0  ;;  %v2295_v12 = vpop.f32.mrb[51].mxu1 }
 0x1aa   : > { %v1748_v23 = vpop.f32.mrb[85].mxu0  ;;  %v1757_v41 = vadd.f32 %v5373_v27, %v4378_v21  ;;  %v2936_v59 = vadd.f32 %v2935_v1, %v2651_v33  ;;  %v2296_v17 = vadd.f32 %v5373_v27, %v2295_v12  ;;  %v2655_v26 = vmax.f32 %v2293_v63, 0.0  ;;  %v4518_v38 = vpop.f32.mrb[52].mxu1 }
 0x1ab   : > { %v2782_v34 = vadd.f32 %v2781_v20, %v2517_v6  ;;  %v1749_v35 = vadd.f32 %v5373_v27, %v1748_v23  ;;  %v4379_v36 = vpop.f32.mrb[86].mxu0  ;;  %v2301_v23 = vadd.f32 %v5373_v27, %v4514_v54 }
 0x1ac   : > { %v1751_v37 = vpop.f32.mrb[87].mxu0  ;;  %v1760_v56 = vadd.f32 %v5373_v27, %v4379_v36  ;;  %v2521_v2 = vmax.f32 %v1757_v41, 0.0  ;;  %v2937_v14 = vadd.f32 %v2936_v59, %v2652_v50  ;;  %v2304_v36 = vadd.f32 %v5373_v27, %v4515_v0 }
 0x1ad   : > { %v2519_v42 = vmax.f32 %v1749_v35, 0.0  ;;  %v2783_v43 = vadd.f32 %v2782_v34, %v2518_v31  ;;  %v1752_v45 = vadd.f32 %v5373_v27, %v1751_v37  ;;  %v2656_v37 = vmax.f32 %v2296_v17, 0.0 }
 0x1ae   : > { %v2522_v18 = vmax.f32 %v1760_v56, 0.0  ;;  %v2938_v22 = vadd.f32 %v2937_v14, %v2653_v62  ;;  %v2657_v1 = vmax.f32 %v2301_v23, 0.0  ;;  %v2658_v62 = vmax.f32 %v2304_v36, 0.0 }
 0x1af   : > { %v2784_v55 = vadd.f32 %v2783_v43, %v2519_v42  ;;  %v2520_v60 = vmax.f32 %v1752_v45, 0.0  ;;  %v4755_v42 = vld [vmem:[%s5929_s3 + $0x60] ss:$16 sps:$4 sm:$0xff]   ;;  %v4757_v43 = vld [vmem:[%s5929_s3 + $0x64] ss:$16 sps:$4 sm:$0xff]   ;;  %v2308_v45 = vpop.f32.mrb[53].mxu1 }
 0x1b0   : > { %v2939_v35 = vadd.f32 %v2938_v22, %v2654_v11  ;;  %v4519_v50 = vpop.f32.mrb[54].mxu1  ;;  %3247 = vmatprep.subr.bf16.mxu1 %v4757_v43  ;;  %v2309_v63 = vadd.f32 %v5373_v27, %v2308_v45 }
 0x1b1   : > { %v2785_v4 = vadd.f32 %v2784_v55, %v2520_v60  ;;  %v4382_v8 = vpop.f32.mrb[88].mxu0  ;;  %v2311_v60 = vpop.f32.mrb[55].mxu1  ;;  %3248 = vmatpush1.bf16.msra.mxu1 %v4755_v42 }
 0x1b2   : > { %v1764_v13 = vpop.f32.mrb[89].mxu0  ;;  %v1773_v30 = vadd.f32 %v5373_v27, %v4382_v8  ;;  %v2940_v49 = vadd.f32 %v2939_v35, %v2655_v26  ;;  %v2312_v0 = vadd.f32 %v5373_v27, %v2311_v60 }
 0x1b3   : > { %v2786_v19 = vadd.f32 %v2785_v4, %v2521_v2  ;;  %v1765_v6 = vadd.f32 %v5373_v27, %v1764_v13  ;;  %v4383_v20 = vpop.f32.mrb[90].mxu0  ;;  %v2317_v13 = vadd.f32 %v5373_v27, %v4518_v38 }
 0x1b4   : > { %v1767_v21 = vpop.f32.mrb[91].mxu0  ;;  %v1776_v33 = vadd.f32 %v5373_v27, %v4383_v20  ;;  %v2525_v54 = vmax.f32 %v1773_v30, 0.0  ;;  %v2941_v59 = vadd.f32 %v2940_v49, %v2656_v37  ;;  %v2660_v30 = vmax.f32 %v2312_v0, 0.0 }
 0x1b5   : > { %v2523_v24 = vmax.f32 %v1765_v6, 0.0  ;;  %v2787_v31 = vadd.f32 %v2786_v19, %v2522_v18  ;;  %v1768_v34 = vadd.f32 %v5373_v27, %v1767_v21  ;;  %v2659_v18 = vmax.f32 %v2309_v63, 0.0 }
 0x1b6   : > { %v2526_v2 = vmax.f32 %v1776_v33, 0.0  ;;  %v2942_v17 = vadd.f32 %v2941_v59, %v2657_v1  ;;  %v2320_v21 = vadd.f32 %v5373_v27, %v4519_v50  ;;  %v2661_v26 = vmax.f32 %v2317_v13, 0.0 }
 0x1b7   : > { %v2788_v40 = vadd.f32 %v2787_v31, %v2523_v24  ;;  %v2524_v41 = vmax.f32 %v1768_v34, 0.0  ;;  %v4522_v24 = vpop.f32.mrb[56].mxu1  ;;  %v2950_v36 = vadd.f32 %v2660_v30, %v2659_v18 }
 0x1b8   : > { %v5419_v23 = vadd.f32 %v2942_v17, %v2658_v62  ;;  %v2324_v35 = vpop.f32.mrb[57].mxu1  ;;  %v2662_v42 = vmax.f32 %v2320_v21, 0.0  ;;  %v2333_v62 = vadd.f32 %v5373_v27, %v4522_v24 }
 0x1b9   : > { %v2789_v55 = vadd.f32 %v2788_v40, %v2524_v41  ;;  %v4386_v56 = vpop.f32.mrb[92].mxu0  ;;  %v2325_v37 = vadd.f32 %v5373_v27, %v2324_v35  ;;  %v4523_v38 = vpop.f32.mrb[58].mxu1  ;;  %v2951_v49 = vadd.f32 %v2950_v36, %v2661_v26 }
 0x1ba   : > { %v1780_v47 = vpop.f32.mrb[93].mxu0  ;;  %v1789_v11 = vadd.f32 %v5373_v27, %v4386_v56  ;;  %v2327_v43 = vpop.f32.mrb[59].mxu1  ;;  %v2336_v13 = vadd.f32 %v5373_v27, %v4523_v38 }
 0x1bb   : > { %v2790_v4 = vadd.f32 %v2789_v55, %v2525_v54  ;;  %v1781_v8 = vadd.f32 %v5373_v27, %v1780_v47  ;;  %v4387_v12 = vpop.f32.mrb[94].mxu0  ;;  %v2663_v56 = vmax.f32 %v2325_v37, 0.0  ;;  %v2328_v60 = vadd.f32 %v5373_v27, %v2327_v43 }
 0x1bc   : > { %v1783_v14 = vpop.f32.mrb[95].mxu0  ;;  %v1792_v22 = vadd.f32 %v5373_v27, %v4387_v12  ;;  %v2529_v40 = vmax.f32 %v1789_v11, 0.0  ;;  %v2665_v12 = vmax.f32 %v2333_v62, 0.0  ;;  %v4526_v11 = vpop.f32.mrb[60].mxu1  ;;  %v2666_v37 = vmax.f32 %v2336_v13, 0.0 }
 0x1bd   : > { %v2527_v19 = vmax.f32 %v1781_v8, 0.0  ;;  %v2791_v6 = vadd.f32 %v2790_v4, %v2526_v2  ;;  %v1784_v20 = vadd.f32 %v5373_v27, %v1783_v14  ;;  %v2952_v2 = vadd.f32 %v2951_v49, %v2662_v42 }
 0x1be   : > { %v2530_v45 = vmax.f32 %v1792_v22, 0.0 }
 0x1bf   : > { %v2792_v31 = vadd.f32 %v2791_v6, %v2527_v19  ;;  %v2528_v34 = vmax.f32 %v1784_v20, 0.0  ;;  %v2953_v18 = vadd.f32 %v2952_v2, %v2663_v56  ;;  %v2664_v19 = vmax.f32 %v2328_v60, 0.0  ;;  %v2340_v6 = vpop.f32.mrb[61].mxu1 }
 0x1c0   : > { %v2341_v20 = vadd.f32 %v5373_v27, %v2340_v6  ;;  %v4527_v21 = vpop.f32.mrb[62].mxu1 }
 0x1c1   : > { %v2793_v33 = vadd.f32 %v2792_v31, %v2528_v34  ;;  %v4390_v41 = vpop.f32.mrb[96].mxu0  ;;  %v2954_v31 = vadd.f32 %v2953_v18, %v2664_v19  ;;  %v2343_v34 = vpop.f32.mrb[63].mxu1 }
 0x1c2   : > { %v1796_v1 = vpop.f32.mrb[97].mxu0  ;;  %v1805_v63 = vadd.f32 %v5373_v27, %v4390_v41  ;;  %v2667_v49 = vmax.f32 %v2341_v20, 0.0 }
 0x1c3   : > { %v2794_v50 = vadd.f32 %v2793_v33, %v2529_v40  ;;  %v1797_v54 = vadd.f32 %v5373_v27, %v1796_v1  ;;  %v4391_v55 = vpop.f32.mrb[98].mxu0  ;;  %v2955_v42 = vadd.f32 %v2954_v31, %v2665_v12  ;;  %v2349_v1 = vadd.f32 %v5373_v27, %v4526_v11 }
 0x1c4   : > { %v1799_v47 = vpop.f32.mrb[99].mxu0  ;;  %v1808_v8 = vadd.f32 %v5373_v27, %v4391_v55  ;;  %v2533_v26 = vmax.f32 %v1805_v63, 0.0 }
 0x1c5   : > { %v2795_v59 = vadd.f32 %v2794_v50, %v2530_v45  ;;  %v1800_v0 = vadd.f32 %v5373_v27, %v1799_v47  ;;  %v2531_v4 = vmax.f32 %v1797_v54, 0.0  ;;  %v2344_v50 = vadd.f32 %v5373_v27, %v2343_v34 }
 0x1c6   : > { %v2534_v35 = vmax.f32 %v1808_v8, 0.0  ;;  %v2956_v62 = vadd.f32 %v2955_v42, %v2666_v37  ;;  %v2669_v12 = vmax.f32 %v2349_v1, 0.0 }
 0x1c7   : > { %v2796_v14 = vrot.slane %v2795_v59, 4  ;;  %v2532_v17 = vmax.f32 %v1800_v0, 0.0  ;;  %v2668_v11 = vmax.f32 %v2344_v50, 0.0 }
 0x1c8   : > { %v2957_v13 = vadd.f32 %v2956_v62, %v2667_v49  ;;  %v4758_v62 = vld [vmem:[%s5929_s3 + $0x80] ss:$16 sps:$4 sm:$0xff]  }
 0x1c9   : > { %v2797_v22 = vadd.f32 %v2796_v14, %v2795_v59  ;;  %v2802_v30 = vadd.f32 %v2532_v17, %v2531_v4  ;;  %v4394_v24 = vpop.f32.mrb[100].mxu0  ;;  %v4530_v59 = vpop.f32.mrb[64].mxu1  ;;  %v2352_v4 = vadd.f32 %v5373_v27, %v4527_v21 }
 0x1ca   : > { %v1812_v36 = vpop.f32.mrb[101].mxu0  ;;  %v1821_v43 = vadd.f32 %v5373_v27, %v4394_v24  ;;  %v2356_v8 = vpop.f32.mrb[65].mxu1  ;;  %v2958_v31 = vadd.f32 %v2957_v13, %v2668_v11 }
 0x1cb   : > { %v2798_v40 = vrot.slane %v2797_v22, 2  ;;  %v2803_v38 = vadd.f32 %v2802_v30, %v2533_v26  ;;  %v1813_v33 = vadd.f32 %v5373_v27, %v1812_v36  ;;  %v4395_v41 = vpop.f32.mrb[102].mxu0  ;;  %v2357_v14 = vadd.f32 %v5373_v27, %v2356_v8  ;;  %v4531_v17 = vpop.f32.mrb[66].mxu1 }
 0x1cc   : > { %v1815_v45 = vpop.f32.mrb[103].mxu0  ;;  %v1824_v47 = vadd.f32 %v5373_v27, %v4395_v41  ;;  %v2537_v19 = vmax.f32 %v1821_v43, 0.0  ;;  %v2670_v24 = vmax.f32 %v2352_v4, 0.0 }
 0x1cd   : > { %v2799_v54 = vadd.f32 %v2798_v40, %v2797_v22  ;;  %v2535_v55 = vmax.f32 %v1813_v33, 0.0  ;;  %v2804_v56 = vadd.f32 %v2803_v38, %v2534_v35  ;;  %v1816_v60 = vadd.f32 %v5373_v27, %v1815_v45  ;;  %v2359_v22 = vpop.f32.mrb[67].mxu1 }
 0x1ce   : > { %v2538_v26 = vmax.f32 %v1824_v47, 0.0  ;;  %v2959_v38 = vadd.f32 %v2958_v31, %v2669_v12  ;;  %v2365_v33 = vadd.f32 %v5373_v27, %v4530_v59  ;;  %v2671_v41 = vmax.f32 %v2357_v14, 0.0  ;;  %v4760_v59 = vld [vmem:[%s5929_s3 + $0x84] ss:$16 sps:$4 sm:$0xff]  }
 0x1cf   : > { %v2800_v63 = vrot.slane %v2799_v54, 1  ;;  %v2805_v0 = vadd.f32 %v2804_v56, %v2535_v55  ;;  %v2536_v2 = vmax.f32 %v1816_v60, 0.0  ;;  %v2360_v42 = vadd.f32 %v5373_v27, %v2359_v22  ;;  %v4534_v55 = vpop.f32.mrb[68].mxu1  ;;  %3249 = vmatprep.subr.bf16.mxu1 %v4760_v59 }
 0x1d0   : > { %3250 = vmatpush1.bf16.msra.mxu1 %v4758_v62 }
 0x1d1   : > { %v2801_v18 = vadd.f32 %v2800_v63, %v2799_v54  ;;  %v2806_v6 = vadd.f32 %v2805_v0, %v2536_v2  ;;  %v4398_v20 = vpop.f32.mrb[104].mxu0  ;;  %v2960_v54 = vadd.f32 %v2959_v38, %v2670_v24  ;;  %v2368_v63 = vadd.f32 %v5373_v27, %v4531_v17  ;;  %v2372_v0 = vpop.f32.mrb[69].mxu1 }
 0x1d2   : > { %v1828_v30 = vpop.f32.mrb[105].mxu0  ;;  %v1837_v21 = vadd.f32 %v5373_v27, %v4398_v20  ;;  %v2673_v2 = vmax.f32 %v2365_v33, 0.0  ;;  %v2672_v8 = vmax.f32 %v2360_v42, 0.0  ;;  %v2373_v12 = vadd.f32 %v5373_v27, %v2372_v0 }
 0x1d3   : > { %v2989_v34 = vpack.c.bf16 %v2801_v18, %v2801_v18  ;;  %v2807_v35 = vadd.f32 %v2806_v6, %v2537_v19  ;;  %v1829_v36 = vadd.f32 %v5373_v27, %v1828_v30  ;;  %v4399_v37 = vpop.f32.mrb[106].mxu0  ;;  %v2961_v4 = vadd.f32 %v2960_v54, %v2671_v41 }
 0x1d4   : > { %v1831_v40 = vpop.f32.mrb[107].mxu0  ;;  %v1840_v50 = vadd.f32 %v5373_v27, %v4399_v37  ;;  %v2541_v13 = vmax.f32 %v1837_v21, 0.0  ;;  %v2674_v6 = vmax.f32 %v2368_v63, 0.0  ;;  %v2675_v21 = vmax.f32 %v2373_v12, 0.0 }
 0x1d5   : > { %v3059_v43 = vunpack.c.l.b16 %v2989_v34  ;;  %v2539_v45 = vmax.f32 %v1829_v36, 0.0  ;;  %v2808_v1 = vadd.f32 %v2807_v35, %v2538_v26  ;;  %v1832_v49 = vadd.f32 %v5373_v27, %v1831_v40 }
 0x1d6   : > { %v2962_v20 = vadd.f32 %v2961_v4, %v2672_v8  ;;  %v2542_v26 = vmax.f32 %v1840_v50, 0.0  ;;  %v2381_v35 = vadd.f32 %v5373_v27, %v4534_v55 }
 0x1d7   : > { %v5446_v56 = vsel %vm3067_vm1, %v3059_v43, %v5353_v28  ;;  %v2809_v60 = vadd.f32 %v2808_v1, %v2539_v45  ;;  %v2540_v47 = vmax.f32 %v1832_v49, 0.0  ;;  %v4535_v28 = vpop.f32.mrb[70].mxu1 }
 0x1d8   : > { %v2375_v18 = vpop.f32.mrb[71].mxu1  ;;  %v2963_v34 = vadd.f32 %v2962_v20, %v2673_v2  ;;  %v2384_v41 = vadd.f32 %v5373_v27, %v4535_v28  ;;  %v2677_v54 = vmax.f32 %v2381_v35, 0.0 }
 0x1d9   : > { %v2810_v11 = vadd.f32 %v2809_v60, %v2540_v47  ;;  %v4402_v14 = vpop.f32.mrb[108].mxu0  ;;  %v2376_v22 = vadd.f32 %v5373_v27, %v2375_v18  ;;  %v4538_v43 = vpop.f32.mrb[72].mxu1 }
 0x1da   : > { %v1844_v19 = vpop.f32.mrb[109].mxu0  ;;  %v1853_v36 = vadd.f32 %v5373_v27, %v4402_v14  ;;  %v2964_v33 = vadd.f32 %v2963_v34, %v2674_v6  ;;  %v2388_v50 = vpop.f32.mrb[73].mxu1  ;;  %v2678_v4 = vmax.f32 %v2384_v41, 0.0  ;;  %v2397_v6 = vadd.f32 %v5373_v27, %v4538_v43 }
 0x1db   : > { %v2811_v17 = vadd.f32 %v2810_v11, %v2541_v13  ;;  %v1845_v30 = vadd.f32 %v5373_v27, %v1844_v19  ;;  %v4403_v24 = vpop.f32.mrb[110].mxu0  ;;  %v2676_v42 = vmax.f32 %v2376_v22, 0.0  ;;  %v2389_v55 = vadd.f32 %v5373_v27, %v2388_v50  ;;  %v4539_v47 = vpop.f32.mrb[74].mxu1 }
 0x1dc   : > { %v1847_v31 = vpop.f32.mrb[111].mxu0  ;;  %v1856_v1 = vadd.f32 %v5373_v27, %v4403_v24  ;;  %v2965_v60 = vadd.f32 %v2964_v33, %v2675_v21  ;;  %v2545_v62 = vmax.f32 %v1853_v36, 0.0  ;;  %v2391_v0 = vpop.f32.mrb[75].mxu1 }
 0x1dd   : > { %v2543_v37 = vmax.f32 %v1845_v30, 0.0  ;;  %v2812_v40 = vadd.f32 %v2811_v17, %v2542_v26  ;;  %v1848_v38 = vadd.f32 %v5373_v27, %v1847_v31  ;;  %v2392_v12 = vadd.f32 %v5373_v27, %v2391_v0  ;;  %v4542_v35 = vpop.f32.mrb[76].mxu1 }
 0x1de   : > { %v2966_v8 = vadd.f32 %v2965_v60, %v2676_v42  ;;  %v2546_v28 = vmax.f32 %v1856_v1, 0.0  ;;  %v2679_v20 = vmax.f32 %v2389_v55, 0.0  ;;  %v2400_v31 = vadd.f32 %v5373_v27, %v4539_v47 }
 0x1df   : > { %v2813_v45 = vadd.f32 %v2812_v40, %v2543_v37  ;;  %v2544_v49 = vmax.f32 %v1848_v38, 0.0  ;;  %v2680_v34 = vmax.f32 %v2392_v12, 0.0  ;;  %v2404_v40 = vpop.f32.mrb[77].mxu1  ;;  %v2681_v38 = vmax.f32 %v2397_v6, 0.0 }
 0x1e0   : > { %v2967_v19 = vadd.f32 %v2966_v8, %v2677_v54  ;;  %v2405_v41 = vadd.f32 %v5373_v27, %v2404_v40  ;;  %v4543_v42 = vpop.f32.mrb[78].mxu1  ;;  %v2682_v54 = vmax.f32 %v2400_v31, 0.0 }
 0x1e1   : > { %v2814_v59 = vadd.f32 %v2813_v45, %v2544_v49  ;;  %v4406_v63 = vpop.f32.mrb[112].mxu0  ;;  %v2407_v49 = vpop.f32.mrb[79].mxu1 }
 0x1e2   : > { %v1860_v2 = vpop.f32.mrb[113].mxu0  ;;  %v1869_v22 = vadd.f32 %v5373_v27, %v4406_v63  ;;  %v2968_v24 = vadd.f32 %v2967_v19, %v2678_v4  ;;  %v2408_v55 = vadd.f32 %v5373_v27, %v2407_v49  ;;  %v2413_v4 = vadd.f32 %v5373_v27, %v4542_v35  ;;  %v4546_v6 = vpop.f32.mrb[80].mxu1 }
 0x1e3   : > { %v2815_v13 = vadd.f32 %v2814_v59, %v2545_v62  ;;  %v1861_v11 = vadd.f32 %v5373_v27, %v1860_v2  ;;  %v4407_v14 = vpop.f32.mrb[114].mxu0  ;;  %v2683_v8 = vmax.f32 %v2405_v41, 0.0 }
 0x1e4   : > { %v1863_v18 = vpop.f32.mrb[115].mxu0  ;;  %v1872_v36 = vadd.f32 %v5373_v27, %v4407_v14  ;;  %v2969_v33 = vadd.f32 %v2968_v24, %v2679_v20  ;;  %v2549_v43 = vmax.f32 %v1869_v22, 0.0  ;;  %v2684_v19 = vmax.f32 %v2408_v55, 0.0 }
 0x1e5   : > { %v2547_v26 = vmax.f32 %v1861_v11, 0.0  ;;  %v2816_v17 = vadd.f32 %v2815_v13, %v2546_v28  ;;  %v1864_v30 = vadd.f32 %v5373_v27, %v1863_v18  ;;  %v2416_v18 = vadd.f32 %v5373_v27, %v4543_v42 }
 0x1e6   : > { %v2970_v60 = vadd.f32 %v2969_v33, %v2680_v34  ;;  %v2550_v47 = vmax.f32 %v1872_v36, 0.0 }
 0x1e7   : > { %v2817_v21 = vadd.f32 %v2816_v17, %v2547_v26  ;;  %v2548_v37 = vmax.f32 %v1864_v30, 0.0  ;;  %v2420_v17 = vpop.f32.mrb[81].mxu1  ;;  %v2685_v30 = vmax.f32 %v2413_v4, 0.0 }
 0x1e8   : > { %v2971_v2 = vadd.f32 %v2970_v60, %v2681_v38  ;;  %v2421_v31 = vadd.f32 %v5373_v27, %v2420_v17  ;;  %v4547_v34 = vpop.f32.mrb[82].mxu1  ;;  %v2686_v38 = vmax.f32 %v2416_v18, 0.0 }
 0x1e9   : > { %v2818_v45 = vadd.f32 %v2817_v21, %v2548_v37  ;;  %v4410_v1 = vpop.f32.mrb[116].mxu0  ;;  %v2423_v37 = vpop.f32.mrb[83].mxu1 }
 0x1ea   : > { %v1876_v50 = vpop.f32.mrb[117].mxu0  ;;  %v1885_v12 = vadd.f32 %v5373_v27, %v4410_v1  ;;  %v2972_v14 = vadd.f32 %v2971_v2, %v2682_v54  ;;  %v2424_v41 = vadd.f32 %v5373_v27, %v2423_v37  ;;  %v2429_v54 = vadd.f32 %v5373_v27, %v4546_v6 }
 0x1eb   : > { %v2819_v62 = vadd.f32 %v2818_v45, %v2549_v43  ;;  %v1877_v59 = vadd.f32 %v5373_v27, %v1876_v50  ;;  %v4411_v63 = vpop.f32.mrb[118].mxu0  ;;  %v2687_v60 = vmax.f32 %v2421_v31, 0.0  ;;  %v2432_v2 = vadd.f32 %v5373_v27, %v4547_v34  ;;  %v4763_v31 = vld [vmem:[%s5929_s3 + $0xa4] ss:$16 sps:$4 sm:$0xff]  }
 0x1ec   : > { %v1879_v0 = vpop.f32.mrb[119].mxu0  ;;  %v1888_v22 = vadd.f32 %v5373_v27, %v4411_v63  ;;  %v2973_v24 = vadd.f32 %v2972_v14, %v2683_v8  ;;  %v2553_v35 = vmax.f32 %v1885_v12, 0.0  ;;  %v2688_v4 = vmax.f32 %v2424_v41, 0.0  ;;  %3251 = vmatprep.subr.bf16.mxu1 %v4763_v31 }
 0x1ed   : > { %v2551_v28 = vmax.f32 %v1877_v59, 0.0  ;;  %v2820_v13 = vadd.f32 %v2819_v62, %v2550_v47  ;;  %v1880_v11 = vadd.f32 %v5373_v27, %v1879_v0 }
 0x1ee   : > { %v2974_v33 = vadd.f32 %v2973_v24, %v2684_v19  ;;  %v2554_v42 = vmax.f32 %v1888_v22, 0.0  ;;  %v4761_v24 = vld [vmem:[%s5929_s3 + $0xa0] ss:$16 sps:$4 sm:$0xff]  }
 0x1ef   : > { %v2821_v20 = vadd.f32 %v2820_v13, %v2551_v28  ;;  %v2552_v26 = vmax.f32 %v1880_v11, 0.0  ;;  %v2689_v28 = vmax.f32 %v2429_v54, 0.0  ;;  %3252 = vmatpush1.bf16.msra.mxu1 %v4761_v24 }
 0x1f0   : > { %v2975_v50 = vadd.f32 %v2974_v33, %v2685_v30 }
 0x1f1   : > { %v2822_v21 = vadd.f32 %v2821_v20, %v2552_v26  ;;  %v4414_v36 = vpop.f32.mrb[120].mxu0  ;;  %v2690_v20 = vmax.f32 %v2432_v2, 0.0  ;;  %v4772_v2 = vld [vmem:[%s5929_s3 + $0xc] ss:$16 sps:$4 sm:$0xff]  }
 0x1f2   : > { %v1892_v40 = vpop.f32.mrb[121].mxu0  ;;  %v1901_v55 = vadd.f32 %v5373_v27, %v4414_v36  ;;  %v2976_v0 = vadd.f32 %v2975_v50, %v2686_v38  ;;  %v4958_v36 = vmov 0  }
 0x1f3   : > { %v2823_v43 = vadd.f32 %v2822_v21, %v2553_v35  ;;  %v1893_v45 = vadd.f32 %v5373_v27, %v1892_v40  ;;  %v4415_v1 = vpop.f32.mrb[122].mxu0  ;;  %v4766_v21 = vld [vmem:[%s5929_s3 + $0xc4] ss:$16 sps:$4 sm:$0xff]   ;;  %3273 = vmatprep.mubr.bf16.mxu1 %v4958_v36 }
 0x1f4   : > { %v1895_v49 = vpop.f32.mrb[123].mxu0  ;;  %v1904_v63 = vadd.f32 %v5373_v27, %v4415_v1  ;;  %v2977_v13 = vadd.f32 %v2976_v0, %v2687_v60  ;;  %v2557_v11 = vmax.f32 %v1901_v55, 0.0  ;;  %3253 = vmatprep.subr.bf16.mxu1 %v4766_v21 }
 0x1f5   : > { %v2555_v47 = vmax.f32 %v1893_v45, 0.0  ;;  %v2824_v62 = vadd.f32 %v2823_v43, %v2554_v42  ;;  %v1896_v59 = vadd.f32 %v5373_v27, %v1895_v49  ;;  %v4764_v42 = vld [vmem:[%s5929_s3 + $0xc0] ss:$16 sps:$4 sm:$0xff]   ;;  %v4769_v49 = vld [vmem:[%s5929_s3 + $0xe4] ss:$16 sps:$4 sm:$0xff]  }
 0x1f6   : > { %v2558_v19 = vmax.f32 %v1904_v63, 0.0  ;;  %v2978_v22 = vadd.f32 %v2977_v13, %v2688_v4  ;;  %3254 = vmatpush1.bf16.msra.mxu1 %v4764_v42 }
 0x1f7   : > { %v2825_v8 = vadd.f32 %v2824_v62, %v2555_v47  ;;  %v2556_v12 = vmax.f32 %v1896_v59, 0.0  ;;  %v4767_v47 = vld [vmem:[%s5929_s3 + $0xe0] ss:$16 sps:$4 sm:$0xff]   ;;  %3255 = vmatprep.subr.bf16.mxu1 %v4769_v49 }
 0x1f8   : > { %v2979_v35 = vadd.f32 %v2978_v22, %v2689_v28 }
 0x1f9   : > { %v2826_v14 = vadd.f32 %v2825_v8, %v2556_v12  ;;  %v4418_v18 = vpop.f32.mrb[124].mxu0 }
 0x1fa   : > { %v1908_v6 = vpop.f32.mrb[125].mxu0  ;;  %v1917_v37 = vadd.f32 %v5373_v27, %v4418_v18  ;;  %v5500_v41 = vadd.f32 %v2979_v35, %v2690_v20  ;;  %3256 = vmatpush1.bf16.msra.mxu1 %v4767_v47 }
 0x1fb   : > { %v2827_v26 = vadd.f32 %v2826_v14, %v2557_v11  ;;  %v1909_v17 = vadd.f32 %v5373_v27, %v1908_v6  ;;  %v4419_v30 = vpop.f32.mrb[126].mxu0  ;;  %3282 = vmatprep.subr.bf16.mxu1 %v4772_v2 }
 0x1fc   : > { %v1911_v34 = vpop.f32.mrb[127].mxu0  ;;  %v1920_v45 = vadd.f32 %v5373_v27, %v4419_v30  ;;  %v2561_v50 = vmax.f32 %v1917_v37, 0.0 }
 0x1fd   : > { %v2559_v40 = vmax.f32 %v1909_v17, 0.0  ;;  %v2828_v38 = vadd.f32 %v2827_v26, %v2558_v19  ;;  %v1912_v33 = vadd.f32 %v5373_v27, %v1911_v34 }
 0x1fe   : > { %v2562_v62 = vmax.f32 %v1920_v45, 0.0 }
 0x1ff   : > { %v2829_v43 = vadd.f32 %v2828_v38, %v2559_v40  ;;  %v2560_v1 = vmax.f32 %v1912_v33, 0.0 }
 0x201   : > { %v2830_v54 = vadd.f32 %v2829_v43, %v2560_v1  ;;  %v4422_v60 = vpop.f32.mrb[128].mxu0 }
 0x202   : > { %v1924_v55 = vpop.f32.mrb[129].mxu0  ;;  %v1933_v12 = vadd.f32 %v5373_v27, %v4422_v60 }
 0x203   : > { %v2831_v59 = vadd.f32 %v2830_v54, %v2561_v50  ;;  %v1925_v63 = vadd.f32 %v5373_v27, %v1924_v55  ;;  %v4423_v0 = vpop.f32.mrb[130].mxu0 }
 0x204   : > { %v1927_v4 = vpop.f32.mrb[131].mxu0  ;;  %v1936_v14 = vadd.f32 %v5373_v27, %v4423_v0  ;;  %v2565_v6 = vmax.f32 %v1933_v12, 0.0 }
 0x205   : > { %v2832_v8 = vadd.f32 %v2831_v59, %v2562_v62  ;;  %v1928_v28 = vadd.f32 %v5373_v27, %v1927_v4  ;;  %v2563_v11 = vmax.f32 %v1925_v63, 0.0 }
 0x206   : > { %v2566_v30 = vmax.f32 %v1936_v14, 0.0 }
 0x207   : > { %v2833_v13 = vrot.slane %v2832_v8, 4  ;;  %v2564_v18 = vmax.f32 %v1928_v28, 0.0 }
 0x209   : > { %v2834_v19 = vadd.f32 %v2833_v13, %v2832_v8  ;;  %v2839_v20 = vadd.f32 %v2564_v18, %v2563_v11  ;;  %v4426_v22 = vpop.f32.mrb[132].mxu0 }
 0x20a   : > { %v1940_v26 = vpop.f32.mrb[133].mxu0  ;;  %v1949_v35 = vadd.f32 %v5373_v27, %v4426_v22 }
 0x20b   : > { %v2835_v17 = vrot.slane %v2834_v19, 2  ;;  %v2840_v24 = vadd.f32 %v2839_v20, %v2565_v6  ;;  %v1941_v31 = vadd.f32 %v5373_v27, %v1940_v26  ;;  %v4427_v34 = vpop.f32.mrb[134].mxu0 }
 0x20c   : > { %v1943_v21 = vpop.f32.mrb[135].mxu0  ;;  %v1952_v45 = vadd.f32 %v5373_v27, %v4427_v34  ;;  %v2569_v50 = vmax.f32 %v1949_v35, 0.0 }
 0x20d   : > { %v2836_v37 = vadd.f32 %v2835_v17, %v2834_v19  ;;  %v2567_v40 = vmax.f32 %v1941_v31, 0.0  ;;  %v2841_v38 = vadd.f32 %v2840_v24, %v2566_v30  ;;  %v1944_v33 = vadd.f32 %v5373_v27, %v1943_v21 }
 0x20e   : > { %v2570_v62 = vmax.f32 %v1952_v45, 0.0 }
 0x20f   : > { %v2837_v42 = vrot.slane %v2836_v37, 1  ;;  %v2842_v43 = vadd.f32 %v2841_v38, %v2567_v40  ;;  %v2568_v1 = vmax.f32 %v1944_v33, 0.0 }
 0x211   : > { %v2838_v49 = vadd.f32 %v2837_v42, %v2836_v37  ;;  %v2843_v54 = vadd.f32 %v2842_v43, %v2568_v1  ;;  %v4430_v60 = vpop.f32.mrb[136].mxu0 }
 0x212   : > { %v1956_v55 = vpop.f32.mrb[137].mxu0  ;;  %v1965_v2 = vadd.f32 %v5373_v27, %v4430_v60 }
 0x213   : > { %v2990_v47 = vpack.c.bf16 %v2838_v49, %v2838_v49  ;;  %v2844_v59 = vadd.f32 %v2843_v54, %v2569_v50  ;;  %v1957_v63 = vadd.f32 %v5373_v27, %v1956_v55  ;;  %v4431_v0 = vpop.f32.mrb[138].mxu0 }
 0x214   : > { %v1959_v4 = vpop.f32.mrb[139].mxu0  ;;  %v1968_v18 = vadd.f32 %v5373_v27, %v4431_v0  ;;  %v2573_v6 = vmax.f32 %v1965_v2, 0.0 }
 0x215   : > { %v3060_v8 = vunpack.c.l.b16 %v2990_v47  ;;  %v2571_v12 = vmax.f32 %v1957_v63, 0.0  ;;  %v2845_v28 = vadd.f32 %v2844_v59, %v2570_v62  ;;  %v1960_v13 = vadd.f32 %v5373_v27, %v1959_v4 }
 0x216   : > { %v2574_v17 = vmax.f32 %v1968_v18, 0.0 }
 0x217   : > { %v5527_v11 = vsel %vm3069_vm2, %v3060_v8, %v5446_v56  ;;  %v2846_v14 = vadd.f32 %v2845_v28, %v2571_v12  ;;  %v2572_v19 = vmax.f32 %v1960_v13, 0.0 }
 0x219   : > { %v2847_v20 = vadd.f32 %v2846_v14, %v2572_v19  ;;  %v4434_v22 = vpop.f32.mrb[140].mxu0 }
 0x21a   : > { %v1972_v26 = vpop.f32.mrb[141].mxu0  ;;  %v1981_v35 = vadd.f32 %v5373_v27, %v4434_v22 }
 0x21b   : > { %v2848_v30 = vadd.f32 %v2847_v20, %v2573_v6  ;;  %v1973_v24 = vadd.f32 %v5373_v27, %v1972_v26  ;;  %v4435_v31 = vpop.f32.mrb[142].mxu0 }
 0x21c   : > { %v1975_v34 = vpop.f32.mrb[143].mxu0  ;;  %v1984_v38 = vadd.f32 %v5373_v27, %v4435_v31  ;;  %v2577_v42 = vmax.f32 %v1981_v35, 0.0 }
 0x21d   : > { %v2575_v21 = vmax.f32 %v1973_v24, 0.0  ;;  %v2849_v37 = vadd.f32 %v2848_v30, %v2574_v17  ;;  %v1976_v56 = vadd.f32 %v5373_v27, %v1975_v34 }
 0x21e   : > { %v2578_v49 = vmax.f32 %v1984_v38, 0.0 }
 0x21f   : > { %v2850_v40 = vadd.f32 %v2849_v37, %v2575_v21  ;;  %v2576_v33 = vmax.f32 %v1976_v56, 0.0 }
 0x221   : > { %v2851_v43 = vadd.f32 %v2850_v40, %v2576_v33  ;;  %v4438_v45 = vpop.f32.mrb[144].mxu0  ;;  %v5545_v33 = vld [vmem:[%s5928_s2] ss:$0 sm:$0xff] }
 0x222   : > { %v1988_v1 = vpop.f32.mrb[145].mxu0  ;;  %v1997_v47 = vadd.f32 %v5373_v27, %v4438_v45 }
 0x223   : > { %v2852_v50 = vadd.f32 %v2851_v43, %v2577_v42  ;;  %v1989_v54 = vadd.f32 %v5373_v27, %v1988_v1  ;;  %v4439_v60 = vpop.f32.mrb[146].mxu0 }
 0x224   : > { %v1991_v55 = vpop.f32.mrb[147].mxu0  ;;  %v2000_v2 = vadd.f32 %v5373_v27, %v4439_v60  ;;  %v2581_v8 = vmax.f32 %v1997_v47, 0.0 }
 0x225   : > { %v2579_v62 = vmax.f32 %v1989_v54, 0.0  ;;  %v2853_v59 = vadd.f32 %v2852_v50, %v2578_v49  ;;  %v1992_v63 = vadd.f32 %v5373_v27, %v1991_v55 }
 0x226   : > { %v2582_v14 = vmax.f32 %v2000_v2, 0.0 }
 0x227   : > { %v2854_v0 = vadd.f32 %v2853_v59, %v2579_v62  ;;  %v2580_v4 = vmax.f32 %v1992_v63, 0.0 }
 0x229   : > { %v2855_v12 = vadd.f32 %v2854_v0, %v2580_v4  ;;  %v4442_v28 = vpop.f32.mrb[148].mxu0 }
 0x22a   : > { %v2004_v13 = vpop.f32.mrb[149].mxu0  ;;  %v2013_v22 = vadd.f32 %v5373_v27, %v4442_v28 }
 0x22b   : > { %v2856_v18 = vadd.f32 %v2855_v12, %v2581_v8  ;;  %v2005_v19 = vadd.f32 %v5373_v27, %v2004_v13  ;;  %v4443_v6 = vpop.f32.mrb[150].mxu0 }
 0x22c   : > { %v2007_v20 = vpop.f32.mrb[151].mxu0  ;;  %v2016_v31 = vadd.f32 %v5373_v27, %v4443_v6  ;;  %v2585_v35 = vmax.f32 %v2013_v22, 0.0 }
 0x22d   : > { %v2583_v26 = vmax.f32 %v2005_v19, 0.0  ;;  %v2857_v17 = vadd.f32 %v2856_v18, %v2582_v14  ;;  %v2008_v30 = vadd.f32 %v5373_v27, %v2007_v20 }
 0x22e   : > { %v2586_v40 = vmax.f32 %v2016_v31, 0.0 }
 0x22f   : > { %v2858_v24 = vadd.f32 %v2857_v17, %v2583_v26  ;;  %v2584_v34 = vmax.f32 %v2008_v30, 0.0 }
 0x231   : > { %v2859_v21 = vadd.f32 %v2858_v24, %v2584_v34  ;;  %v4446_v37 = vpop.f32.mrb[152].mxu0 }
 0x232   : > { %v2020_v56 = vpop.f32.mrb[153].mxu0  ;;  %v2029_v1 = vadd.f32 %v5545_v33, %v4446_v37 }
 0x233   : > { %v2860_v38 = vadd.f32 %v2859_v21, %v2585_v35  ;;  %v2021_v42 = vadd.f32 %v5545_v33, %v2020_v56  ;;  %v4447_v43 = vpop.f32.mrb[154].mxu0 }
 0x234   : > { %v2023_v45 = vpop.f32.mrb[155].mxu0  ;;  %v2032_v60 = vadd.f32 %v5545_v33, %v4447_v43  ;;  %v2589_v47 = vmax.f32 %v2029_v1, 0.0 }
 0x235   : > { %v2587_v49 = vmax.f32 %v2021_v42, 0.0  ;;  %v2861_v27 = vadd.f32 %v2860_v38, %v2586_v40  ;;  %v2024_v50 = vadd.f32 %v5545_v33, %v2023_v45 }
 0x236   : > { %v2590_v0 = vmax.f32 %v2032_v60, 0.0 }
 0x237   : > { %v2862_v54 = vadd.f32 %v2861_v27, %v2587_v49  ;;  %v2588_v55 = vmax.f32 %v2024_v50, 0.0 }
 0x239   : > { %v2863_v62 = vadd.f32 %v2862_v54, %v2588_v55  ;;  %v4450_v59 = vpop.f32.mrb[156].mxu0 }
 0x23a   : > { %v2036_v63 = vpop.f32.mrb[157].mxu0  ;;  %v2045_v28 = vadd.f32 %v5545_v33, %v4450_v59 }
 0x23b   : > { %v2864_v2 = vadd.f32 %v2863_v62, %v2589_v47  ;;  %v2037_v4 = vadd.f32 %v5545_v33, %v2036_v63  ;;  %v4451_v8 = vpop.f32.mrb[158].mxu0 }
 0x23c   : > { %v2039_v12 = vpop.f32.mrb[159].mxu0  ;;  %v2048_v6 = vadd.f32 %v5545_v33, %v4451_v8  ;;  %v2593_v22 = vmax.f32 %v2045_v28, 0.0 }
 0x23d   : > { %v2591_v13 = vmax.f32 %v2037_v4, 0.0  ;;  %v2865_v14 = vadd.f32 %v2864_v2, %v2590_v0  ;;  %v2040_v18 = vadd.f32 %v5545_v33, %v2039_v12 }
 0x23e   : > { %v2594_v24 = vmax.f32 %v2048_v6, 0.0 }
 0x23f   : > { %v2866_v19 = vadd.f32 %v2865_v14, %v2591_v13  ;;  %v2592_v20 = vmax.f32 %v2040_v18, 0.0 }
 0x241   : > { %v2867_v26 = vadd.f32 %v2866_v19, %v2592_v20  ;;  %v4454_v17 = vpop.f32.mrb[160].mxu0 }
 0x242   : > { %v2052_v30 = vpop.f32.mrb[161].mxu0  ;;  %v2061_v56 = vadd.f32 %v5545_v33, %v4454_v17 }
 0x243   : > { %v2868_v31 = vadd.f32 %v2867_v26, %v2593_v22  ;;  %v2053_v34 = vadd.f32 %v5545_v33, %v2052_v30  ;;  %v4455_v35 = vpop.f32.mrb[162].mxu0 }
 0x244   : > { %v2055_v21 = vpop.f32.mrb[163].mxu0  ;;  %v2064_v43 = vadd.f32 %v5545_v33, %v4455_v35  ;;  %v2597_v49 = vmax.f32 %v2061_v56, 0.0 }
 0x245   : > { %v2869_v37 = vadd.f32 %v2868_v31, %v2594_v24  ;;  %v2056_v40 = vadd.f32 %v5545_v33, %v2055_v21  ;;  %v2595_v42 = vmax.f32 %v2053_v34, 0.0 }
 0x246   : > { %v2598_v55 = vmax.f32 %v2064_v43, 0.0 }
 0x247   : > { %v2870_v38 = vrot.slane %v2869_v37, 4  ;;  %v2596_v45 = vmax.f32 %v2056_v40, 0.0 }
 0x249   : > { %v2871_v1 = vadd.f32 %v2870_v38, %v2869_v37  ;;  %v2876_v27 = vadd.f32 %v2596_v45, %v2595_v42  ;;  %v4458_v50 = vpop.f32.mrb[164].mxu0 }
 0x24a   : > { %v2068_v54 = vpop.f32.mrb[165].mxu0  ;;  %v2077_v63 = vadd.f32 %v5545_v33, %v4458_v50 }
 0x24b   : > { %v2872_v60 = vrot.slane %v2871_v1, 2  ;;  %v2877_v47 = vadd.f32 %v2876_v27, %v2597_v49  ;;  %v2069_v62 = vadd.f32 %v5545_v33, %v2068_v54  ;;  %v4459_v59 = vpop.f32.mrb[166].mxu0  ;;  %v2101_v49 = vadd.f32 %v5545_v33, %v5250_v48 }
 0x24c   : > { %v2071_v0 = vpop.f32.mrb[167].mxu0  ;;  %v2080_v14 = vadd.f32 %v5545_v33, %v4459_v59  ;;  %v2601_v6 = vmax.f32 %v2077_v63, 0.0  ;;  %v2104_v54 = vadd.f32 %v5545_v33, %v5257_v57  ;;  %v2112_v59 = vadd.f32 %v5545_v33, %v5253_v51 }
 0x24d   : > { %v2873_v2 = vadd.f32 %v2872_v60, %v2871_v1  ;;  %v2599_v4 = vmax.f32 %v2069_v62, 0.0  ;;  %v2878_v8 = vadd.f32 %v2877_v47, %v2598_v55  ;;  %v2072_v12 = vadd.f32 %v5545_v33, %v2071_v0 }
 0x24e   : > { %v2602_v30 = vmax.f32 %v2080_v14, 0.0  ;;  %v2109_v47 = vadd.f32 %v5545_v33, %v5248_v44  ;;  %v2607_v62 = vmax.f32 %v2101_v49, 0.0  ;;  %v2608_v63 = vmax.f32 %v2104_v54, 0.0 }
 0x24f   : > { %v2874_v28 = vrot.slane %v2873_v2, 1  ;;  %v2879_v13 = vadd.f32 %v2878_v8, %v2599_v4  ;;  %v2600_v18 = vmax.f32 %v2072_v12, 0.0  ;;  %v2117_v48 = vadd.f32 %v5545_v33, %v5264_v7 }
 0x250   : > { %v2610_v8 = vmax.f32 %v2112_v59, 0.0  ;;  %v2120_v57 = vadd.f32 %v5545_v33, %v5271_v16  ;;  %v2125_v44 = vadd.f32 %v5545_v33, %v5262_v3  ;;  %v2128_v51 = vadd.f32 %v5545_v33, %v5267_v10 }
 0x251   : > { %v2875_v19 = vadd.f32 %v2874_v28, %v2873_v2  ;;  %v2880_v20 = vadd.f32 %v2879_v13, %v2600_v18  ;;  %v4462_v22 = vpop.f32.mrb[168].mxu0  ;;  %v2609_v2 = vmax.f32 %v2109_v47, 0.0  ;;  %v2611_v28 = vmax.f32 %v2117_v48, 0.0 }
 0x252   : > { %v2084_v26 = vpop.f32.mrb[169].mxu0  ;;  %v2093_v35 = vadd.f32 %v5545_v33, %v4462_v22  ;;  %v2612_v14 = vmax.f32 %v2120_v57, 0.0  ;;  %v2133_v7 = vadd.f32 %v5545_v33, %v5278_v29  ;;  %v2136_v16 = vadd.f32 %v5545_v33, %v5285_v39 }
 0x253   : > { %v2991_v17 = vpack.c.bf16 %v2875_v19, %v2875_v19  ;;  %v2881_v24 = vadd.f32 %v2880_v20, %v2601_v6  ;;  %v2085_v31 = vadd.f32 %v5545_v33, %v2084_v26  ;;  %v4463_v34 = vpop.f32.mrb[170].mxu0  ;;  %v2613_v19 = vmax.f32 %v2125_v44, 0.0 }
 0x254   : > { %v2087_v21 = vpop.f32.mrb[171].mxu0  ;;  %v2096_v45 = vadd.f32 %v5545_v33, %v4463_v34  ;;  %v2605_v27 = vmax.f32 %v2093_v35, 0.0  ;;  %v2614_v20 = vmax.f32 %v2128_v51, 0.0  ;;  %v2141_v3 = vadd.f32 %v5545_v33, %v5276_v25 }
 0x255   : > { %v3061_v37 = vunpack.c.l.b16 %v2991_v17  ;;  %v2603_v56 = vmax.f32 %v2085_v31, 0.0  ;;  %v2882_v40 = vadd.f32 %v2881_v24, %v2602_v30  ;;  %v2088_v38 = vadd.f32 %v5545_v33, %v2087_v21 }
 0x256   : > { %v2606_v60 = vmax.f32 %v2096_v45, 0.0  ;;  %v2615_v26 = vmax.f32 %v2133_v7, 0.0  ;;  %v2144_v10 = vadd.f32 %v5545_v33, %v5281_v32  ;;  %v2616_v30 = vmax.f32 %v2136_v16, 0.0 }
 0x257   : > { %v5567_v42 = vsel %vm3071_vm3, %v3061_v37, %v5527_v11  ;;  %v2883_v43 = vadd.f32 %v2882_v40, %v2603_v56  ;;  %v2604_v1 = vmax.f32 %v2088_v38, 0.0  ;;  %v2617_v31 = vmax.f32 %v2141_v3, 0.0 }
 0x258   : > { %v2149_v29 = vadd.f32 %v5545_v33, %v5292_v52  ;;  %v2618_v35 = vmax.f32 %v2144_v10, 0.0  ;;  %v2152_v39 = vadd.f32 %v5545_v33, %v5296_v58  ;;  %v2157_v25 = vadd.f32 %v5545_v33, %v5289_v46  ;;  %v4773_v10 = vld [vmem:[%s5929_s3 + $0x28] ss:$16 sps:$4 sm:$0xff]  }
 0x259   : > { %v2884_v50 = vadd.f32 %v2883_v43, %v2604_v1  ;;  %v2160_v32 = vadd.f32 %v5545_v33, %v5294_v53  ;;  %v2165_v52 = vadd.f32 %v5545_v33, %v5303_v5  ;;  %v2944_v1 = vrot.slane %v5419_v23, 4 }
 0x25a   : > { %v2619_v37 = vmax.f32 %v2149_v29, 0.0  ;;  %v2620_v40 = vmax.f32 %v2152_v39, 0.0  ;;  %v2621_v43 = vmax.f32 %v2157_v25, 0.0  ;;  %v2168_v58 = vadd.f32 %v5545_v33, %v5310_v15  ;;  %v4782_v29 = vld [vmem:[%s5929_s3 + $0x88] ss:$16 sps:$4 sm:$0xff]  }
 0x25b   : > { %v2885_v55 = vadd.f32 %v2884_v50, %v2605_v27  ;;  %v2622_v49 = vmax.f32 %v2160_v32, 0.0  ;;  %v2981_v46 = vrot.slane %v5500_v41, 4  ;;  %v2173_v50 = vadd.f32 %v5545_v33, %v5299_v61  ;;  %v4790_v39 = vld [vmem:[%s5929_s3 + $0xcc] ss:$16 sps:$4 sm:$0xff]   ;;  %v4794_v32 = vld [vmem:[%s5931_s5] ss:$8 sps:$4 sm:$0xff]  }
 0x25c   : > { %v2623_v53 = vmax.f32 %v2165_v52, 0.0  ;;  %v2176_v5 = vadd.f32 %v5545_v33, %v5306_v9  ;;  %v4793_v25 = vld [vmem:[%s5929_s3 + $0xec] ss:$16 sps:$4 sm:$0xff]   ;;  %v4800_v52 = vld [vmem:[%s5931_s5 + $0x20] ss:$8 sps:$4 sm:$0xff]  }
 0x25d   : > { %v2886_v11 = vadd.f32 %v2885_v55, %v2606_v60  ;;  %v2945_v60 = vadd.f32 %v2944_v1, %v5419_v23  ;;  %v2624_v55 = vmax.f32 %v2168_v58, 0.0  ;;  %v2982_v47 = vadd.f32 %v2981_v46, %v5500_v41  ;;  %v4803_v1 = vld [vmem:[%s5931_s5 + $0x30] ss:$8 sps:$4 sm:$0xff]   ;;  %v4806_v58 = vld [vmem:[%s5931_s5 + $0x40] ss:$8 sps:$4 sm:$0xff]  }
 0x25e   : > { %v4809_v46 = vld [vmem:[%s5931_s5 + $0x50] ss:$8 sps:$4 sm:$0xff]  }
 0x25f   : > { %v2887_v0 = vadd.f32 %v2886_v11, %v2607_v62  ;;  %v2625_v11 = vmax.f32 %v2173_v50, 0.0  ;;  %v2946_v15 = vrot.slane %v2945_v60, 2  ;;  %v4814_v50 = vld [vmem:[%s5931_s5 + $0x64] ss:$8 sps:$4 sm:$0xff]  }
 0x261   : > { %v2888_v4 = vadd.f32 %v2887_v0, %v2608_v63  ;;  %v2626_v63 = vmax.f32 %v2176_v5, 0.0  ;;  %v2983_v0 = vrot.slane %v2982_v47, 2  ;;  %v4820_v5 = vld [vmem:[%s5931_s5 + $0x84] ss:$8 sps:$4 sm:$0xff]  }
 0x263   : > { %v2889_v12 = vadd.f32 %v2888_v4, %v2609_v2  ;;  %v2947_v4 = vadd.f32 %v2946_v15, %v2945_v60  ;;  %v2984_v61 = vadd.f32 %v2983_v0, %v2982_v47  ;;  %v4815_v60 = vld [vmem:[%s5931_s5 + $0x70] ss:$8 sps:$4 sm:$0xff]   ;;  %v4823_v47 = vld [vmem:[%s5931_s5 + $0x94] ss:$8 sps:$4 sm:$0xff]   ;;  %v4832_v0 = vld [vmem:[%s5931_s5 + $0xc4] ss:$8 sps:$4 sm:$0xff]  }
 0x264   : > { %v4829_v15 = vld [vmem:[%s5931_s5 + $0xb4] ss:$8 sps:$4 sm:$0xff]  }
 0x265   : > { %v2890_v13 = vadd.f32 %v2889_v12, %v2610_v8  ;;  %v2948_v12 = vrot.slane %v2947_v4, 1  ;;  %v2985_v23 = vrot.slane %v2984_v61, 1 }
 0x267   : > { %v2891_v18 = vadd.f32 %v2890_v13, %v2611_v28  ;;  %v2949_v9 = vadd.f32 %v2948_v12, %v2947_v4  ;;  %v2986_v33 = vadd.f32 %v2985_v23, %v2984_v61  ;;  %v4833_v4 = vld [vmem:[%s5931_s5 + $0xd0] ss:$8 sps:$4 sm:$0xff]   ;;  %v4838_v61 = vld [vmem:[%s5931_s5 + $0xe4] ss:$8 sps:$4 sm:$0xff]  }
 0x268   : > { %v4839_v12 = vld [vmem:[%s5931_s5 + $0xf0] ss:$8 sps:$4 sm:$0xff]   ;;  %v4844_v23 = vld [vmem:[%s5931_s5 + $0x104] ss:$8 sps:$4 sm:$0xff]  }
 0x269   : > { %v2892_v6 = vadd.f32 %v2891_v18, %v2612_v14  ;;  %v2993_v51 = vpack.c.bf16 %v2949_v9, %v2949_v9  ;;  %v2994_v14 = vpack.c.bf16 %v2986_v33, %v2986_v33  ;;  %v5766_v33 = vld [vmem:[%s5930_s4] sm:$0xf] }
 0x26b   : > { %v2893_v22 = vadd.f32 %v2892_v6, %v2613_v19  ;;  %v3063_v7 = vunpack.c.l.b16 %v2993_v51  ;;  %v3064_v6 = vunpack.c.l.b16 %v2994_v14 }
 0x26d   : > { %v2894_v17 = vadd.f32 %v2893_v22, %v2614_v20  ;;  %v4770_v22 = vld [vmem:[%s5929_s3 + $0x8] ss:$16 sps:$4 sm:$0xff]  }
 0x26f   : > { %v2895_v24 = vadd.f32 %v2894_v17, %v2615_v26  ;;  %v4775_v17 = vld [vmem:[%s5929_s3 + $0x2c] ss:$16 sps:$4 sm:$0xff]  }
 0x271   : > { %v2896_v34 = vadd.f32 %v2895_v24, %v2616_v30  ;;  %v4776_v30 = vld [vmem:[%s5929_s3 + $0x48] ss:$16 sps:$4 sm:$0xff]   ;;  %v4781_v24 = vld [vmem:[%s5929_s3 + $0x6c] ss:$16 sps:$4 sm:$0xff]  }
 0x273   : > { %v2897_v21 = vadd.f32 %v2896_v34, %v2617_v31  ;;  %v4784_v31 = vld [vmem:[%s5929_s3 + $0x8c] ss:$16 sps:$4 sm:$0xff]  }
 0x274   : > { %v4787_v34 = vld [vmem:[%s5929_s3 + $0xac] ss:$16 sps:$4 sm:$0xff]  }
 0x275   : > { %v2898_v56 = vadd.f32 %v2897_v21, %v2618_v35  ;;  %v4785_v35 = vld [vmem:[%s5929_s3 + $0xa8] ss:$16 sps:$4 sm:$0xff]  }
 0x276   : > { %v4788_v21 = vld [vmem:[%s5929_s3 + $0xc8] ss:$16 sps:$4 sm:$0xff]  }
 0x277   : > { %v2899_v38 = vadd.f32 %v2898_v56, %v2619_v37  ;;  %v4791_v37 = vld [vmem:[%s5929_s3 + $0xe8] ss:$16 sps:$4 sm:$0xff]   ;;  %v4796_v56 = vld [vmem:[%s5931_s5 + $0x4] ss:$8 sps:$4 sm:$0xff]  }
 0x279   : > { %v2900_v45 = vadd.f32 %v2899_v38, %v2620_v40  ;;  %v4799_v40 = vld [vmem:[%s5931_s5 + $0x14] ss:$8 sps:$4 sm:$0xff]   ;;  %v4797_v38 = vld [vmem:[%s5931_s5 + $0x10] ss:$8 sps:$4 sm:$0xff]  }
 0x27b   : > { %v2901_v27 = vadd.f32 %v2900_v45, %v2621_v43  ;;  %v4802_v43 = vld [vmem:[%s5931_s5 + $0x24] ss:$8 sps:$4 sm:$0xff]   ;;  %v4805_v45 = vld [vmem:[%s5931_s5 + $0x34] ss:$8 sps:$4 sm:$0xff]  }
 0x27d   : > { %v2902_v54 = vadd.f32 %v2901_v27, %v2622_v49  ;;  %v4808_v49 = vld [vmem:[%s5931_s5 + $0x44] ss:$8 sps:$4 sm:$0xff]   ;;  %v4811_v27 = vld [vmem:[%s5931_s5 + $0x54] ss:$8 sps:$4 sm:$0xff]  }
 0x27f   : > { %v2903_v62 = vadd.f32 %v2902_v54, %v2623_v53  ;;  %v4812_v53 = vld [vmem:[%s5931_s5 + $0x60] ss:$8 sps:$4 sm:$0xff]   ;;  %v4817_v54 = vld [vmem:[%s5931_s5 + $0x74] ss:$8 sps:$4 sm:$0xff]  }
 0x281   : > { %v2904_v59 = vadd.f32 %v2903_v62, %v2624_v55  ;;  %v4818_v55 = vld [vmem:[%s5931_s5 + $0x80] ss:$8 sps:$4 sm:$0xff]   ;;  %v4821_v62 = vld [vmem:[%s5931_s5 + $0x90] ss:$8 sps:$4 sm:$0xff]  }
 0x283   : > { %v2905_v2 = vadd.f32 %v2904_v59, %v2625_v11  ;;  %v4826_v11 = vld [vmem:[%s5931_s5 + $0xa4] ss:$8 sps:$4 sm:$0xff]   ;;  %v4824_v59 = vld [vmem:[%s5931_s5 + $0xa0] ss:$8 sps:$4 sm:$0xff]  }
 0x285   : > { %v2906_v48 = vadd.f32 %v2905_v2, %v2626_v63  ;;  %v4827_v63 = vld [vmem:[%s5931_s5 + $0xb0] ss:$8 sps:$4 sm:$0xff]   ;;  %v4830_v2 = vld [vmem:[%s5931_s5 + $0xc0] ss:$8 sps:$4 sm:$0xff]  }
 0x287   : > { %v2907_v8 = vrot.slane %v2906_v48, 4 }
 0x289   : > { %v2908_v57 = vadd.f32 %v2907_v8, %v2906_v48  ;;  %v4835_v48 = vld [vmem:[%s5931_s5 + $0xd4] ss:$8 sps:$4 sm:$0xff]   ;;  %v4836_v8 = vld [vmem:[%s5931_s5 + $0xe0] ss:$8 sps:$4 sm:$0xff]  }
 0x28b   : > { %v2909_v44 = vrot.slane %v2908_v57, 2 }
 0x28d   : > { %v2910_v28 = vadd.f32 %v2909_v44, %v2908_v57  ;;  %v4841_v57 = vld [vmem:[%s5931_s5 + $0xf4] ss:$8 sps:$4 sm:$0xff]   ;;  %v3029_v44 = vlaneseq }
 0x28f   : > { %v2911_v13 = vrot.slane %v2910_v28, 1 }
 0x291   : > { %v2912_v41 = vadd.f32 %v2911_v13, %v2910_v28  ;;  %v5760_v28 = vshrl.u32 %v3029_v44, 7 }
 0x293   : > { %v2992_v18 = vpack.c.bf16 %v2912_v41, %v2912_v41  ;;  %v3031_v9 = vsub.s32 0, %v5760_v28  ;;  %v3035_v13 = vsub.s32 1, %v5760_v28 }
 0x295   : > { %v3062_v19 = vunpack.c.l.b16 %v2992_v18  ;;  %v3032_v41 = vrot.slane %v5766_v33, %v3031_v9  ;;  %v3036_v51 = vrot.slane %v5766_v33, %v3035_v13 }
 0x297   : > { %v3074_v20 = vsel %vm3073_vm4, %v3062_v19, %v5567_v42  ;;  %v4778_v42 = vld [vmem:[%s5929_s3 + $0x4c] ss:$16 sps:$4 sm:$0xff]  }
 0x298   : > { %v3076_v16 = vsel %vm3075_vm5, %v3063_v7, %v3074_v20 }
 0x299   : > { %v3078_v3 = vsel %vm3077_vm6, %v3064_v6, %v3076_v16 }
 0x29a   : > { %v3079_v26 = vpack.c.b16 %v3078_v3, %v3078_v3 }
 0x29c   : > { %3274 = vmatmul.mubr.bf16.vlgmr.msra.gmra.mrb[84].mxu1 %v3079_v26 }
 0x29d   : > { %3283 = vmatpush1.bf16.msra.mxu1 %v4770_v22  ;;  %3314 = vmatprep.mubr.bf16.mxu1 %v4958_v36  ;;  %v4779_v36 = vld [vmem:[%s5929_s3 + $0x68] ss:$16 sps:$4 sm:$0xff]  }
 0x29e   : > { %3284 = vmatprep.subr.bf16.mxu1 %v4775_v17  ;;  %v4842_v22 = vld [vmem:[%s5931_s5 + $0x100] ss:$8 sps:$4 sm:$0xff]   ;;  %v4845_v17 = vld [vmem:[%s5931_s5 + $0x110] ss:$8 sps:$4 sm:$0xff]  }
 0x2a1   : > { %3285 = vmatpush1.bf16.msra.mxu1 %v4773_v10  ;;  %v4850_v10 = vld [vmem:[%s5931_s5 + $0x124] ss:$8 sps:$4 sm:$0xff]  }
 0x2a2   : > { %3286 = vmatprep.subr.bf16.mxu1 %v4778_v42  ;;  %v4848_v42 = vld [vmem:[%s5931_s5 + $0x120] ss:$8 sps:$4 sm:$0xff]  }
 0x2a5   : > { %3287 = vmatpush1.bf16.msra.mxu1 %v4776_v30  ;;  %v4853_v30 = vld [vmem:[%s5931_s5 + $0x134] ss:$8 sps:$4 sm:$0xff]  }
 0x2a6   : > { %3288 = vmatprep.subr.bf16.mxu1 %v4781_v24  ;;  %v4851_v24 = vld [vmem:[%s5931_s5 + $0x130] ss:$8 sps:$4 sm:$0xff]  }
 0x2a9   : > { %3289 = vmatpush1.bf16.msra.mxu1 %v4779_v36  ;;  %v4856_v36 = vld [vmem:[%s5931_s5 + $0x144] ss:$8 sps:$4 sm:$0xff]  }
 0x2aa   : > { %3290 = vmatprep.subr.bf16.mxu1 %v4784_v31  ;;  %v4854_v31 = vld [vmem:[%s5931_s5 + $0x140] ss:$8 sps:$4 sm:$0xff]  }
 0x2ad   : > { %3291 = vmatpush1.bf16.msra.mxu1 %v4782_v29  ;;  %v4859_v29 = vld [vmem:[%s5931_s5 + $0x154] ss:$8 sps:$4 sm:$0xff]  }
 0x2ae   : > { %3292 = vmatprep.subr.bf16.mxu1 %v4787_v34  ;;  %v4857_v34 = vld [vmem:[%s5931_s5 + $0x150] ss:$8 sps:$4 sm:$0xff]  }
 0x2b1   : > { %3293 = vmatpush1.bf16.msra.mxu1 %v4785_v35  ;;  %v4862_v35 = vld [vmem:[%s5931_s5 + $0x164] ss:$8 sps:$4 sm:$0xff]  }
 0x2b2   : > { %3294 = vmatprep.subr.bf16.mxu1 %v4790_v39  ;;  %v3043_v39 = vsub.s32 3, %v5760_v28 }
 0x2b5   : > { %3295 = vmatpush1.bf16.msra.mxu1 %v4788_v21  ;;  %v4860_v21 = vld [vmem:[%s5931_s5 + $0x160] ss:$8 sps:$4 sm:$0xff]  }
 0x2b6   : > { %3296 = vmatprep.subr.bf16.mxu1 %v4793_v25  ;;  %v4865_v25 = vld [vmem:[%s5931_s5 + $0x174] ss:$8 sps:$4 sm:$0xff]  }
 0x2b9   : > { %3297 = vmatpush1.bf16.msra.mxu1 %v4791_v37  ;;  %v3044_v37 = vrot.slane %v5766_v33, %v3043_v39 }
 0x2ba   : > { %3723 = vmatprep.subr.bf16.mxu1 %v4796_v56 }
 0x2bc   : > { %3315 = vmatmul.mubr.bf16.vlgmr.msra.gmra.mrb[88].mxu1 %v3079_v26  ;;  %v4847_v26 = vld [vmem:[%s5931_s5 + $0x114] ss:$8 sps:$4 sm:$0xff]  }
 0x2bd   : > { %3724 = vmatpush1.bf16.msra.mxu1 %v4794_v32  ;;  %v4863_v32 = vld [vmem:[%s5931_s5 + $0x170] ss:$8 sps:$4 sm:$0xff]  }
 0x2be   : > { %3725 = vmatprep.subr.bf16.mxu1 %v4799_v40 }
 0x2c1   : > { %3726 = vmatpush1.bf16.msra.mxu1 %v4797_v38  ;;  %v4868_v38 = vld [vmem:[%s5931_s5 + $0x184] ss:$8 sps:$4 sm:$0xff]  }
 0x2c2   : > { %3727 = vmatprep.subr.bf16.mxu1 %v4802_v43 }
 0x2c5   : > { %3728 = vmatpush1.bf16.msra.mxu1 %v4800_v52 }
 0x2c6   : > { %3729 = vmatprep.subr.bf16.mxu1 %v4805_v45 }
 0x2c9   : > { %3730 = vmatpush1.bf16.msra.mxu1 %v4803_v1 }
 0x2ca   : > { %3731 = vmatprep.subr.bf16.mxu1 %v4808_v49  ;;  %v4866_v49 = vld [vmem:[%s5931_s5 + $0x180] ss:$8 sps:$4 sm:$0xff]  }
 0x2cd   : > { %3732 = vmatpush1.bf16.msra.mxu1 %v4806_v58  ;;  %v4871_v58 = vld [vmem:[%s5931_s5 + $0x194] ss:$8 sps:$4 sm:$0xff]  }
 0x2ce   : > { %3733 = vmatprep.subr.bf16.mxu1 %v4811_v27  ;;  %v4869_v27 = vld [vmem:[%s5931_s5 + $0x190] ss:$8 sps:$4 sm:$0xff]  }
 0x2d1   : > { %3734 = vmatpush1.bf16.msra.mxu1 %v4809_v46  ;;  %v4874_v46 = vld [vmem:[%s5931_s5 + $0x1a4] ss:$8 sps:$4 sm:$0xff]  }
 0x2d2   : > { %3735 = vmatprep.subr.bf16.mxu1 %v4814_v50  ;;  %v4872_v50 = vld [vmem:[%s5931_s5 + $0x1a0] ss:$8 sps:$4 sm:$0xff]  }
 0x2d5   : > { %3736 = vmatpush1.bf16.msra.mxu1 %v4812_v53  ;;  %v4877_v53 = vld [vmem:[%s5931_s5 + $0x1b4] ss:$8 sps:$4 sm:$0xff]  }
 0x2d6   : > { %3737 = vmatprep.subr.bf16.mxu1 %v4817_v54  ;;  %v4875_v54 = vld [vmem:[%s5931_s5 + $0x1b0] ss:$8 sps:$4 sm:$0xff]  }
 0x2d9   : > { %3738 = vmatpush1.bf16.msra.mxu1 %v4815_v60  ;;  %v4880_v60 = vld [vmem:[%s5931_s5 + $0x1c4] ss:$8 sps:$4 sm:$0xff]  }
 0x2da   : > { %3739 = vmatprep.subr.bf16.mxu1 %v4820_v5  ;;  %v4878_v5 = vld [vmem:[%s5931_s5 + $0x1c0] ss:$8 sps:$4 sm:$0xff]  }
 0x2dd   : > { %3740 = vmatpush1.bf16.msra.mxu1 %v4818_v55  ;;  %v4883_v55 = vld [vmem:[%s5931_s5 + $0x1d4] ss:$8 sps:$4 sm:$0xff]  }
 0x2de   : > { %3741 = vmatprep.subr.bf16.mxu1 %v4823_v47  ;;  %v4881_v47 = vld [vmem:[%s5931_s5 + $0x1d0] ss:$8 sps:$4 sm:$0xff]  }
 0x2e1   : > { %3742 = vmatpush1.bf16.msra.mxu1 %v4821_v62  ;;  %v3039_v62 = vsub.s32 2, %v5760_v28 }
 0x2e2   : > { %3743 = vmatprep.subr.bf16.mxu1 %v4826_v11  ;;  %v4886_v11 = vld [vmem:[%s5931_s5 + $0x1e4] ss:$8 sps:$4 sm:$0xff]  }
 0x2e5   : > { %3744 = vmatpush1.bf16.msra.mxu1 %v4824_v59  ;;  %v4884_v59 = vld [vmem:[%s5931_s5 + $0x1e0] ss:$8 sps:$4 sm:$0xff]  }
 0x2e6   : > { %3745 = vmatprep.subr.bf16.mxu1 %v4829_v15  ;;  %v3040_v15 = vrot.slane %v5766_v33, %v3039_v62 }
 0x2e9   : > { %3746 = vmatpush1.bf16.msra.mxu1 %v4827_v63  ;;  %v4889_v63 = vld [vmem:[%s5931_s5 + $0x1f4] ss:$8 sps:$4 sm:$0xff]  }
 0x2ea   : > { %3747 = vmatprep.subr.bf16.mxu1 %v4832_v0  ;;  %v4887_v0 = vld [vmem:[%s5931_s5 + $0x1f0] ss:$8 sps:$4 sm:$0xff]  }
 0x2ed   : > { %3748 = vmatpush1.bf16.msra.mxu1 %v4830_v2 }
 0x2ee   : > { %3749 = vmatprep.subr.bf16.mxu1 %v4835_v48 }
 0x2f1   : > { %3750 = vmatpush1.bf16.msra.mxu1 %v4833_v4  ;;  %v3391_v4 = vld [vmem:[%s5932_s6] sm:$0x3] }
 0x2f2   : > { %3751 = vmatprep.subr.bf16.mxu1 %v4838_v61  ;;  %v3396_v61 = vrot.slane %v3391_v4, %v3031_v9 }
 0x2f5   : > { %3752 = vmatpush1.bf16.msra.mxu1 %v4836_v8  ;;  %v3400_v8 = vrot.slane %v3391_v4, %v3035_v13 }
 0x2f6   : > { %3753 = vmatprep.subr.bf16.mxu1 %v4841_v57 }
 0x2f9   : > { %3754 = vmatpush1.bf16.msra.mxu1 %v4839_v12 }
 0x2fa   : > { %3764 = vmatprep.subr.bf16.mxu1 %v4844_v23 }
 0x36f   : > { %v3275_v14 = vpop.f32.mrb[84].mxu1 }
 0x370   : > { %v3276_v18 = vadd.f32 %v3275_v14, %v3032_v41  ;;  %v3277_v19 = vpop.f32.mrb[85].mxu1 }
 0x371   : > { %v3278_v7 = vadd.f32 %v3277_v19, %v3036_v51  ;;  %v3279_v6 = vpop.f32.mrb[86].mxu1 }
 0x372   : > { %v3280_v20 = vpop.f32.mrb[87].mxu1  ;;  %v3323_v3 = vpack.c.bf16 %v3276_v18, %v3276_v18 }
 0x373   : > { %v3324_v16 = vpack.c.bf16 %v3278_v7, %v3278_v7 }
 0x375   : > { %3755 = vmatprep.mubr.bf16.mxu1 %v3324_v16 }
 0x376   : > { %3756 = vmatmul.mubr.bf16.vlgmr.msra.gmra.mrb[92].mxu1 %v3323_v3 }
 0x377   : > { %3765 = vmatpush1.bf16.msra.mxu1 %v4842_v22 }
 0x378   : > { %3766 = vmatprep.subr.bf16.mxu1 %v4847_v26 }
 0x37b   : > { %3767 = vmatpush1.bf16.msra.mxu1 %v4845_v17 }
 0x37c   : > { %3768 = vmatprep.subr.bf16.mxu1 %v4850_v10 }
 0x37f   : > { %3769 = vmatpush1.bf16.msra.mxu1 %v4848_v42 }
 0x380   : > { %3770 = vmatprep.subr.bf16.mxu1 %v4853_v30 }
 0x383   : > { %3771 = vmatpush1.bf16.msra.mxu1 %v4851_v24 }
 0x384   : > { %3772 = vmatprep.subr.bf16.mxu1 %v4856_v36 }
 0x387   : > { %3773 = vmatpush1.bf16.msra.mxu1 %v4854_v31 }
 0x388   : > { %3774 = vmatprep.subr.bf16.mxu1 %v4859_v29 }
 0x38b   : > { %3775 = vmatpush1.bf16.msra.mxu1 %v4857_v34 }
 0x38c   : > { %3776 = vmatprep.subr.bf16.mxu1 %v4862_v35 }
 0x38f   : > { %v3316_v56 = vpop.f32.mrb[88].mxu1  ;;  %3777 = vmatpush1.bf16.msra.mxu1 %v4860_v21 }
 0x390   : > { %v3318_v40 = vpop.f32.mrb[89].mxu1  ;;  %3778 = vmatprep.subr.bf16.mxu1 %v4865_v25  ;;  %v3317_v2 = vadd.f32 %v3316_v56, %v3040_v15 }
 0x391   : > { %v3319_v43 = vadd.f32 %v3318_v40, %v3044_v37  ;;  %v3320_v52 = vpop.f32.mrb[90].mxu1 }
 0x392   : > { %v3321_v45 = vpop.f32.mrb[91].mxu1  ;;  %v3325_v48 = vpack.c.bf16 %v3317_v2, %v3317_v2 }
 0x393   : > { %v3326_v1 = vpack.c.bf16 %v3319_v43, %v3319_v43  ;;  %3779 = vmatpush1.bf16.msra.mxu1 %v4863_v32 }
 0x394   : > { %3780 = vmatprep.subr.bf16.mxu1 %v4868_v38 }
 0x395   : > { %3796 = vmatprep.mubr.bf16.mxu1 %v3326_v1 }
 0x397   : > { %3781 = vmatpush1.bf16.msra.mxu1 %v4866_v49 }
 0x398   : > { %3782 = vmatprep.subr.bf16.mxu1 %v4871_v58 }
 0x39b   : > { %3783 = vmatpush1.bf16.msra.mxu1 %v4869_v27 }
 0x39c   : > { %3784 = vmatprep.subr.bf16.mxu1 %v4874_v46 }
 0x39f   : > { %3785 = vmatpush1.bf16.msra.mxu1 %v4872_v50 }
 0x3a0   : > { %3786 = vmatprep.subr.bf16.mxu1 %v4877_v53 }
 0x3a3   : > { %3787 = vmatpush1.bf16.msra.mxu1 %v4875_v54 }
 0x3a4   : > { %3788 = vmatprep.subr.bf16.mxu1 %v4880_v60 }
 0x3a7   : > { %3789 = vmatpush1.bf16.msra.mxu1 %v4878_v5 }
 0x3a8   : > { %3790 = vmatprep.subr.bf16.mxu1 %v4883_v55 }
 0x3ab   : > { %3791 = vmatpush1.bf16.msra.mxu1 %v4881_v47 }
 0x3ac   : > { %3792 = vmatprep.subr.bf16.mxu1 %v4886_v11 }
 0x3af   : > { %3793 = vmatpush1.bf16.msra.mxu1 %v4884_v59 }
 0x3b0   : > { %3794 = vmatprep.subr.bf16.mxu1 %v4889_v63 }
 0x3b3   : > { %3795 = vmatpush1.bf16.msra.mxu1 %v4887_v0 }
 0x3b6   : > { %3797 = vmatmul.mubr.bf16.vlgmr.msra.gmra.mrb[92].mxu1 %v3325_v48 }
 0x489   : > { %v3798_v57 = vpop.f32.mrb[92].mxu1 }
 0x48a   : > { %v4564_v12 = vadd.f32 %v3798_v57, %v3396_v61  ;;  %v3800_v23 = vpop.f32.mrb[93].mxu1 }
 0x48b   : > { %v4565_v44 = vadd.f32 %v3800_v23, %v3400_v8  ;;  %v3802_v33 = vpop.f32.mrb[94].mxu1 }
 0x48c   : > { %v3803_v41 = vpop.f32.mrb[95].mxu1  ;;  %v3805_v51 = vmul.f32 %v4564_v12, %v4564_v12 }
 0x48d   : > { %v3806_v14 = vmul.f32 %v4565_v44, %v4565_v44 }
 0x48f   : > { %v3807_v18 = vadd.f32 %v3806_v14, %v3805_v51 }
 0x491   : > { %3808 = vadd.xlane.f32.xlu0 %v3807_v18 }
 0x51e   : > { %v3809_v19 = vpop.xlane.xlu0 %3808 }
 0x51f   : > { %v3810_v7 = vadd.f32 1e-10, %v3809_v19 }
 0x521   : > { %4890 = vrsqrt.f32 %v3810_v7 }
 0x52b   : > { %v4891_v9 = vpop.eup %4890 }
 0x52c   : > { %v3812_v28 = vmul.f32 %v4891_v9, %v4564_v12  ;;  %v3813_v13 = vmul.f32 %v4891_v9, %v4565_v44 }
 0x52e   : > { %v3814_v6 = vmul.f32 10.0, %v3812_v28  ;;  %v3815_v20 = vmul.f32 10.0, %v3813_v13 }
 0x530   : > { %3816 = vst [vmem:[%s274_s15] sm:$0xff] %v3814_v6  ;;  %3817 = vst [vmem:[%s274_s15 + $0x8] sm:$0xff] %v3815_v20 }
 0x531   : > { %4907 = shalt.err (!%p4904_p3)
}
 0x532   : > { %s4908_s8 = scalar_lea.hbm %s5884_s19, 256  ;;  %s4912_s13 = scalar_lea.hbm %s5933_s7, 512 }
 0x533   : > { %p4909_p4 = scmp.ne.s32.totalorder %s5884_s19, %s4908_s8  ;;  %p4913_p9 = scmp.lt.u32.totalorder %s5884_s19, %s5933_s7 }
 0x534   : > { %p4914_p10 = scmp.lt.u32.totalorder %s4912_s13, %s4908_s8  ;;  %p4916_p12 = scmp.lt.u32.totalorder %s4908_s8, %s5884_s19 }
 0x535   : > { %p4910_p7 = pnand %p4909_p4, %p5038_p5 }
 0x536   : > { %p4915_p11 = por %p4914_p10, %p4913_p9 }
 0x537   : > { %p4911_p8 = pneg %p4910_p7 }
 0x538   : > { %p4917_p13 = por %p4916_p12, %p4915_p11 }
 0x53a   : > { %p4918_p0 = pnand %p4917_p13, %p4911_p8 }
 0x53c   : > { %4921 = shalt.err (!%p4918_p0)
}
 0x53d   : > { %4570 = dma.vmem_to_hbm [thread:$0]  (%p5038_p5), %s5886_s16, 256, %s5884_s19, %s3819_s20  }
 0x53e PF: > { %p4576_p1 = scmp.ge.s32.totalorder %s4956_s27, 2  ;;  %s3845_s17 = sand.u32 1, %s4944_s24  }
 0x53f   : > { %s3846_s18 = scalar_lea.sflag [#allocation3], %s3845_s17 }
 0x540   : > { %p4573_p2 = pnand %p4576_p1, %p5042_p6 }
 0x542   : > { %4939 = dma.done.wait (!%p4573_p2), %s3846_s18, 256  }
 0x543   : > { %4941 = vsyncadd (!%p4573_p2), %s3846_s18, 4294967040  ;;  %p17_p3 = scmp.ge.s32.totalorder %s5025_s30, 4   ;;  %s5936_s24 = smov %s4948_s25 }
 0x544   : > { %s5937_s25 = smov %s4952_s26  ;;  %s5938_s26 = smov %s5036_s10 }
 0x545   : > { %s5939_s27 = smov %s5025_s30  ;;  %19 = sbr.rel (!%p17_p3) target bundleno = 3 (0x3), region = 83 }
 0x54c   :  { %3851 = vsyncpa [#allocation3], 1 }
 0x54d   :  { %3853 = vsyncpa [#allocation3 + $0x1], 1 }

</bundles_post_ra>
